<compile_context>
chip_gen: v7x
topology: tpu7x:2x2x1
jax: 0.10.0
libtpu: 0.0.40
codegen_flags: <defaults>
</compile_context>

<pallas_src>
import jax
import jax.numpy as jnp
from jax.experimental import pallas as pl
from jax.experimental.pallas import tpu as pltpu

NEG_SLOPE = 0.01  # nn.LeakyReLU() default negative_slope
IN_FEATURES = 3200


def _leaky_relu(h):
    return jnp.where(h >= 0, h, NEG_SLOPE * h)


def _round_up(n, m):
    return ((n + m - 1) // m) * m


def _pick_tile_config():
    """Pick (tb, vmem_limit_bytes) from physical VMEM; fallback fits all generations."""
    vmem_cap = None
    try:
        info = pltpu.get_tpu_info()
        vmem_cap = getattr(info, "vmem_capacity_bytes", None)
    except Exception:
        vmem_cap = None
    if vmem_cap is not None and vmem_cap >= 100 * 1024 * 1024:
        # v5e/v6e (128 MiB physical VMEM): 2 x 26.2 MB double-buffered f32 x tile.
        return 2048, 100 * 1024 * 1024
    # v7x (64 MiB physical VMEM) or unknown: 2 x 13.1 MB double-buffered f32 x tile.
    return 1024, 48 * 1024 * 1024


def mlp_kernel(x_ref,
               w1_ref, b1_ref,
               w2_ref, b2_ref,
               w3_ref, b3_ref,
               w4_ref, b4_ref,
               o_ref):
    # x tile arrives as (TB, 3200) f32; cast to bf16 in VMEM (no extra HBM pass),
    # matmul on the MXU against bf16 W1 with f32 accumulation.
    x = x_ref[...].astype(jnp.bfloat16)
    h = jnp.dot(x, w1_ref[...], preferred_element_type=jnp.float32) + b1_ref[...]
    h = _leaky_relu(h)                                                          # (TB, 128) f32
    h = _leaky_relu(jnp.dot(h, w2_ref[...],
                            preferred_element_type=jnp.float32) + b2_ref[...])  # (TB, 64)
    h = _leaky_relu(jnp.dot(h, w3_ref[...],
                            preferred_element_type=jnp.float32) + b3_ref[...])  # (TB, 64)
    logits = jnp.dot(h, w4_ref[...],
                     preferred_element_type=jnp.float32) + b4_ref[...]          # (TB, 3)
    # softmax over dim=1 (class axis), numerically stable; division on the EUP.
    m = jnp.max(logits, axis=1, keepdims=True)
    e = jnp.exp(logits - m)
    s = jnp.sum(e, axis=1, keepdims=True)
    o_ref[...] = e * pl.reciprocal(s, approx=True)


def mlp_forward(x, params, tb=None, vmem_limit_bytes=None):
    """x: any shape whose trailing dims flatten to 3200 per row (e.g. (B,100,32))."""
    xf = x.reshape(-1, IN_FEATURES)
    if xf.dtype != jnp.float32:
        xf = xf.astype(jnp.float32)
    B = xf.shape[0]

    auto_tb, auto_vmem = _pick_tile_config()
    if tb is None:
        tb = auto_tb
    if vmem_limit_bytes is None:
        vmem_limit_bytes = auto_vmem

    # Batch tile: multiple of 16 (bf16 sublane packing of the in-kernel cast),
    # never over-allocated for tiny batches.
    tb_eff = min(tb, _round_up(B, 16))
    tb_eff = max(16, _round_up(tb_eff, 16))

    (w1, b1), (w2, b2), (w3, b3), (w4, b4) = params

    # W1 is the only big weight; keep it bf16 (MXU-native).  Everything else f32.
    operands = [
        xf,                                                                 # f32 stream
        w1.astype(jnp.bfloat16), b1.reshape(1, -1).astype(jnp.float32),
        w2.astype(jnp.float32),  b2.reshape(1, -1).astype(jnp.float32),
        w3.astype(jnp.float32),  b3.reshape(1, -1).astype(jnp.float32),
        w4.astype(jnp.float32),  b4.reshape(1, -1).astype(jnp.float32),
    ]

    # Ragged last block handled by Pallas masking (no wrapper-side jnp.pad).
    grid = (pl.cdiv(B, tb_eff),)

    in_specs = [pl.BlockSpec((tb_eff, IN_FEATURES), lambda i: (i, 0))]
    # Weights/biases: full-extent blocks, constant index_map -> VMEM-resident
    # across all grid iterations (no re-DMA per tile).
    for a in operands[1:]:
        in_specs.append(pl.BlockSpec(a.shape, lambda i: (0, 0)))

    out_specs = pl.BlockSpec((tb_eff, 3), lambda i: (i, 0))

    out = pl.pallas_call(
        mlp_kernel,
        out_shape=jax.ShapeDtypeStruct((B, 3), jnp.float32),
        grid=grid,
        in_specs=in_specs,
        out_specs=out_specs,
        compiler_params=pltpu.CompilerParams(
            dimension_semantics=("parallel",),
            vmem_limit_bytes=vmem_limit_bytes,
        ),
    )(*operands)

    return out


def mlp_reference(x, params):
    """Pure-JAX f32 reference for correctness checking."""
    h = x.reshape(-1, IN_FEATURES).astype(jnp.float32)
    n_layers = len(params)
    for li, (w, b) in enumerate(params):
        h = h @ w + b
        if li < n_layers - 1:
            h = jnp.where(h >= 0, h, NEG_SLOPE * h)
    return jax.nn.softmax(h, axis=1)


def init_params(key):
    """Deterministic init matching nn.Linear shapes; weights stored as (in, out)."""
    dims = [(3200, 128), (128, 64), (64, 64), (64, 3)]
    params = []
    for (fan_in, fan_out) in dims:
        key, kw, kb = jax.random.split(key, 3)
        bound = 1.0 / (fan_in ** 0.5)  # PyTorch default Linear init range
        w = jax.random.uniform(kw, (fan_in, fan_out), jnp.float32, -bound, bound)
        b = jax.random.uniform(kb, (fan_out,), jnp.float32, -bound, bound)
        params.append((w, b))
    return params


if __name__ == "__main__":
    key = jax.random.PRNGKey(0)
    key, kx1, kx2 = jax.random.split(key, 3)
    params = init_params(key)

    # Case 1: small example consistent with x.view(-1, 100*32): (batch=2, 100, 32).
    x1 = jax.random.normal(kx1, (2, 100, 32), dtype=jnp.float32)
    out1 = jax.block_until_ready(mlp_forward(x1, params))
    assert out1.shape == (2, 3)
    assert bool(jnp.allclose(jnp.sum(out1, axis=1), 1.0, atol=1e-2))
    ref1 = mlp_reference(x1, params)
    assert bool(jnp.allclose(out1, ref1, atol=5e-2))

    # Case 2: exercise the multi-tile grid + ragged (masked) last block: B=40, TB=16.
    x2 = jax.random.normal(kx2, (40, 100, 32), dtype=jnp.float32)
    out2 = jax.block_until_ready(mlp_forward(x2, params, tb=16))
    assert out2.shape == (40, 3)
    assert bool(jnp.allclose(jnp.sum(out2, axis=1), 1.0, atol=1e-2))
    ref2 = mlp_reference(x2, params)
    assert bool(jnp.allclose(out2, ref2, atol=5e-2))

    print("KERNEL_OK")
</pallas_src>

<mosaic_0001>
module attributes {stable_mosaic.version = 11 : i64} {
  func.func @mlp_kernel(%arg0: i32, %arg1: memref<16x3200xf32, #tpu.memory_space<vmem>>, %arg2: memref<3200x128xbf16, #tpu.memory_space<vmem>>, %arg3: memref<1x128xf32, #tpu.memory_space<vmem>>, %arg4: memref<128x64xf32, #tpu.memory_space<vmem>>, %arg5: memref<1x64xf32, #tpu.memory_space<vmem>>, %arg6: memref<64x64xf32, #tpu.memory_space<vmem>>, %arg7: memref<1x64xf32, #tpu.memory_space<vmem>>, %arg8: memref<64x3xf32, #tpu.memory_space<vmem>>, %arg9: memref<1x3xf32, #tpu.memory_space<vmem>>, %arg10: memref<16x3xf32, #tpu.memory_space<vmem>>) attributes {dimension_semantics = [#tpu.dimension_semantics<parallel>], iteration_bounds = array<i64: 1>, scalar_prefetch = 0 : i64, scratch_operands = 0 : i64, tpu.core_type = #tpu.core_type<tc>, window_params = [{transform_indices = @transform_0, window_bounds = array<i64: 16, 3200>}, {pipeline_mode = #tpu.pipeline_mode<synchronous>, transform_indices = @transform_1, window_bounds = array<i64: 3200, 128>}, {pipeline_mode = #tpu.pipeline_mode<synchronous>, transform_indices = @transform_2, window_bounds = array<i64: 1, 128>}, {pipeline_mode = #tpu.pipeline_mode<synchronous>, transform_indices = @transform_3, window_bounds = array<i64: 128, 64>}, {pipeline_mode = #tpu.pipeline_mode<synchronous>, transform_indices = @transform_4, window_bounds = array<i64: 1, 64>}, {pipeline_mode = #tpu.pipeline_mode<synchronous>, transform_indices = @transform_5, window_bounds = array<i64: 64, 64>}, {pipeline_mode = #tpu.pipeline_mode<synchronous>, transform_indices = @transform_6, window_bounds = array<i64: 1, 64>}, {pipeline_mode = #tpu.pipeline_mode<synchronous>, transform_indices = @transform_7, window_bounds = array<i64: 64, 3>}, {pipeline_mode = #tpu.pipeline_mode<synchronous>, transform_indices = @transform_8, window_bounds = array<i64: 1, 3>}, {transform_indices = @transform_9, window_bounds = array<i64: 16, 3>}]} {
    %c0 = arith.constant 0 : index
    %c0_0 = arith.constant 0 : index
    %0 = vector.load %arg1[%c0, %c0_0] : memref<16x3200xf32, #tpu.memory_space<vmem>>, vector<16x3200xf32>
    %1 = arith.truncf %0 : vector<16x3200xf32> to vector<16x3200xbf16>
    %c0_1 = arith.constant 0 : index
    %c0_2 = arith.constant 0 : index
    %2 = vector.load %arg2[%c0_1, %c0_2] : memref<3200x128xbf16, #tpu.memory_space<vmem>>, vector<3200x128xbf16>
    %cst = arith.constant dense<0.000000e+00> : vector<16x128xf32>
    %3 = tpu.matmul %1, %2, %cst {dimension_numbers = #tpu.dot_dimension_numbers<[1], [0], [0], [1], [0, 0, 1, 1], [], []>} : vector<16x3200xbf16>, vector<3200x128xbf16>, vector<16x128xf32> -> vector<16x128xf32>
    %c0_3 = arith.constant 0 : index
    %c0_4 = arith.constant 0 : index
    %4 = vector.load %arg3[%c0_3, %c0_4] : memref<1x128xf32, #tpu.memory_space<vmem>>, vector<1x128xf32>
    %5 = vector.broadcast %4 : vector<1x128xf32> to vector<16x128xf32>
    %6 = arith.addf %3, %5 : vector<16x128xf32>
    %cst_5 = arith.constant 0.000000e+00 : f32
    %7 = vector.broadcast %cst_5 : f32 to vector<16x128xf32>
    %8 = arith.cmpf oge, %6, %7 : vector<16x128xf32>
    %cst_6 = arith.constant 0.00999999977 : f32
    %9 = vector.broadcast %cst_6 : f32 to vector<16x128xf32>
    %10 = arith.mulf %9, %6 : vector<16x128xf32>
    %11 = arith.select %8, %6, %10 : vector<16x128xi1>, vector<16x128xf32>
    %c0_7 = arith.constant 0 : index
    %c0_8 = arith.constant 0 : index
    %12 = vector.load %arg4[%c0_7, %c0_8] : memref<128x64xf32, #tpu.memory_space<vmem>>, vector<128x64xf32>
    %cst_9 = arith.constant dense<0.000000e+00> : vector<16x64xf32>
    %13 = tpu.matmul %11, %12, %cst_9 {dimension_numbers = #tpu.dot_dimension_numbers<[1], [0], [0], [1], [0, 0, 1, 1], [], []>} : vector<16x128xf32>, vector<128x64xf32>, vector<16x64xf32> -> vector<16x64xf32>
    %c0_10 = arith.constant 0 : index
    %c0_11 = arith.constant 0 : index
    %14 = vector.load %arg5[%c0_10, %c0_11] : memref<1x64xf32, #tpu.memory_space<vmem>>, vector<1x64xf32>
    %15 = vector.broadcast %14 : vector<1x64xf32> to vector<16x64xf32>
    %16 = arith.addf %13, %15 : vector<16x64xf32>
    %cst_12 = arith.constant 0.000000e+00 : f32
    %17 = vector.broadcast %cst_12 : f32 to vector<16x64xf32>
    %18 = arith.cmpf oge, %16, %17 : vector<16x64xf32>
    %cst_13 = arith.constant 0.00999999977 : f32
    %19 = vector.broadcast %cst_13 : f32 to vector<16x64xf32>
    %20 = arith.mulf %19, %16 : vector<16x64xf32>
    %21 = arith.select %18, %16, %20 : vector<16x64xi1>, vector<16x64xf32>
    %c0_14 = arith.constant 0 : index
    %c0_15 = arith.constant 0 : index
    %22 = vector.load %arg6[%c0_14, %c0_15] : memref<64x64xf32, #tpu.memory_space<vmem>>, vector<64x64xf32>
    %cst_16 = arith.constant dense<0.000000e+00> : vector<16x64xf32>
    %23 = tpu.matmul %21, %22, %cst_16 {dimension_numbers = #tpu.dot_dimension_numbers<[1], [0], [0], [1], [0, 0, 1, 1], [], []>} : vector<16x64xf32>, vector<64x64xf32>, vector<16x64xf32> -> vector<16x64xf32>
    %c0_17 = arith.constant 0 : index
    %c0_18 = arith.constant 0 : index
    %24 = vector.load %arg7[%c0_17, %c0_18] : memref<1x64xf32, #tpu.memory_space<vmem>>, vector<1x64xf32>
    %25 = vector.broadcast %24 : vector<1x64xf32> to vector<16x64xf32>
    %26 = arith.addf %23, %25 : vector<16x64xf32>
    %cst_19 = arith.constant 0.000000e+00 : f32
    %27 = vector.broadcast %cst_19 : f32 to vector<16x64xf32>
    %28 = arith.cmpf oge, %26, %27 : vector<16x64xf32>
    %cst_20 = arith.constant 0.00999999977 : f32
    %29 = vector.broadcast %cst_20 : f32 to vector<16x64xf32>
    %30 = arith.mulf %29, %26 : vector<16x64xf32>
    %31 = arith.select %28, %26, %30 : vector<16x64xi1>, vector<16x64xf32>
    %c0_21 = arith.constant 0 : index
    %c0_22 = arith.constant 0 : index
    %32 = vector.load %arg8[%c0_21, %c0_22] : memref<64x3xf32, #tpu.memory_space<vmem>>, vector<64x3xf32>
    %cst_23 = arith.constant dense<0.000000e+00> : vector<16x3xf32>
    %33 = tpu.matmul %31, %32, %cst_23 {dimension_numbers = #tpu.dot_dimension_numbers<[1], [0], [0], [1], [0, 0, 1, 1], [], []>} : vector<16x64xf32>, vector<64x3xf32>, vector<16x3xf32> -> vector<16x3xf32>
    %c0_24 = arith.constant 0 : index
    %c0_25 = arith.constant 0 : index
    %34 = vector.load %arg9[%c0_24, %c0_25] : memref<1x3xf32, #tpu.memory_space<vmem>>, vector<1x3xf32>
    %35 = vector.broadcast %34 : vector<1x3xf32> to vector<16x3xf32>
    %36 = arith.addf %33, %35 : vector<16x3xf32>
    %cst_26 = arith.constant dense<0xFF800000> : vector<16xf32>
    %37 = vector.multi_reduction <maximumf>, %36, %cst_26 [1] : vector<16x3xf32> to vector<16xf32>
    %38 = vector.shape_cast %37 : vector<16xf32> to vector<16x1xf32>
    %39 = vector.broadcast %38 : vector<16x1xf32> to vector<16x3xf32>
    %40 = arith.subf %36, %39 : vector<16x3xf32>
    %41 = math.exp %40 : vector<16x3xf32>
    %cst_27 = arith.constant dense<0.000000e+00> : vector<16xf32>
    %42 = vector.multi_reduction <add>, %41, %cst_27 [1] : vector<16x3xf32> to vector<16xf32>
    %43 = vector.shape_cast %42 : vector<16xf32> to vector<16x1xf32>
    %44 = tpu.reciprocal %43 {approx = true} : vector<16x1xf32> -> vector<16x1xf32>
    %45 = vector.broadcast %44 : vector<16x1xf32> to vector<16x3xf32>
    %46 = arith.mulf %41, %45 : vector<16x3xf32>
    %c0_28 = arith.constant 0 : index
    %c0_29 = arith.constant 0 : index
    %47 = vector.load %arg10[%c0_28, %c0_29] : memref<16x3xf32, #tpu.memory_space<vmem>>, vector<16x3xf32>
    tpu.vector_store %arg10[%c0_28, %c0_29], %46 {strides = array<i32>} : memref<16x3xf32, #tpu.memory_space<vmem>>, vector<16x3xf32>,
    return
  }
  func.func @transform_0(%arg0: i32) -> (i32, i32) {
    %c0_i32 = arith.constant 0 : i32
    %c0_i32_0 = arith.constant 0 : i32
    return %arg0, %c0_i32 : i32, i32
  }
  func.func @transform_1(%arg0: i32) -> (i32, i32) {
    %c0_i32 = arith.constant 0 : i32
    %c0_i32_0 = arith.constant 0 : i32
    %c0_i32_1 = arith.constant 0 : i32
    return %c0_i32, %c0_i32_0 : i32, i32
  }
  func.func @transform_2(%arg0: i32) -> (i32, i32) {
    %c0_i32 = arith.constant 0 : i32
    %c0_i32_0 = arith.constant 0 : i32
    %c0_i32_1 = arith.constant 0 : i32
    return %c0_i32, %c0_i32_0 : i32, i32
  }
  func.func @transform_3(%arg0: i32) -> (i32, i32) {
    %c0_i32 = arith.constant 0 : i32
    %c0_i32_0 = arith.constant 0 : i32
    %c0_i32_1 = arith.constant 0 : i32
    return %c0_i32, %c0_i32_0 : i32, i32
  }
  func.func @transform_4(%arg0: i32) -> (i32, i32) {
    %c0_i32 = arith.constant 0 : i32
    %c0_i32_0 = arith.constant 0 : i32
    %c0_i32_1 = arith.constant 0 : i32
    return %c0_i32, %c0_i32_0 : i32, i32
  }
  func.func @transform_5(%arg0: i32) -> (i32, i32) {
    %c0_i32 = arith.constant 0 : i32
    %c0_i32_0 = arith.constant 0 : i32
    %c0_i32_1 = arith.constant 0 : i32
    return %c0_i32, %c0_i32_0 : i32, i32
  }
  func.func @transform_6(%arg0: i32) -> (i32, i32) {
    %c0_i32 = arith.constant 0 : i32
    %c0_i32_0 = arith.constant 0 : i32
    %c0_i32_1 = arith.constant 0 : i32
    return %c0_i32, %c0_i32_0 : i32, i32
  }
  func.func @transform_7(%arg0: i32) -> (i32, i32) {
    %c0_i32 = arith.constant 0 : i32
    %c0_i32_0 = arith.constant 0 : i32
    %c0_i32_1 = arith.constant 0 : i32
    return %c0_i32, %c0_i32_0 : i32, i32
  }
  func.func @transform_8(%arg0: i32) -> (i32, i32) {
    %c0_i32 = arith.constant 0 : i32
    %c0_i32_0 = arith.constant 0 : i32
    %c0_i32_1 = arith.constant 0 : i32
    return %c0_i32, %c0_i32_0 : i32, i32
  }
  func.func @transform_9(%arg0: i32) -> (i32, i32) {
    %c0_i32 = arith.constant 0 : i32
    %c0_i32_0 = arith.constant 0 : i32
    return %arg0, %c0_i32 : i32, i32
  }
}

</mosaic_0001>

<bundles_post_ra>
// kernel: tpu_custom_call.1
= control target key start
LH: loop header
LB: loop body
LE: loop exit
PB: predicated region body
PF: predicated region fallthrough
CT: control target
= control target key end

     0   :  { %14 = vsyncpa [#allocation3], 0  ;;  %s4620_s0 = inlined_call_operand.vmem [shape: f32[2,3200], index: 0, kind: input, shape index: {}]   ;;  %s4621_s1 = inlined_call_operand.hbm [shape: bf16[3200,128], index: 1, kind: input, shape index: {}]   ;;  %s4622_s2 = inlined_call_operand.vmem [shape: f32[1,128], index: 2, kind: input, shape index: {}]   ;;  %s4623_s3 = inlined_call_operand.vmem [shape: f32[128,64], index: 3, kind: input, shape index: {}]   ;;  %s4624_s4 = inlined_call_operand.vmem [shape: f32[1,64], index: 4, kind: input, shape index: {}]   ;;  %s4625_s5 = inlined_call_operand.vmem [shape: f32[64,64], index: 5, kind: input, shape index: {}]   ;;  %s4626_s6 = inlined_call_operand.vmem [shape: f32[1,64], index: 6, kind: input, shape index: {}]   ;;  %s4627_s7 = inlined_call_operand.vmem [shape: f32[64,3], index: 7, kind: input, shape index: {}]   ;;  %s4628_s8 = inlined_call_operand.vmem [shape: f32[1,3], index: 8, kind: input, shape index: {}]   ;;  %s4629_s9 = inlined_call_operand.hbm [shape: f32[2,3], index: 9, kind: output, shape index: {}]  }
   0x1   :  { %15 = vsyncpa [#allocation4], 0  ;;  %s4209_s30 = smov [#allocation2]   ;;  %s4161_s13 = scalar_lea.hbm %s4621_s1, 25600 }
   0x2   :  { %s23_s10 = sshll.u32 %s4209_s30, 4  ;;  %p4162_p0 = scmp.ne.s32.totalorder %s4621_s1, %s4161_s13  ;;  %s24_s10 = int_to_ptr.vmem [resolvable:$true] %s23_s10 }
   0x3   :  { %p4165_p1 = scmp.lt.u32.totalorder %s4161_s13, %s4621_s1 }
   0x5   :  { %p4167_p2 = pnand %p4165_p1, %p4162_p0 }
   0x7   :  { %4170 = shalt.err (!%p4167_p2)
}
   0x8   :  { %s4171_s18 = scalar_lea.vmem %s24_s10, 25600  ;;  %p4176_p4 = scmp.lt.s32.totalorder %s24_s10, %s24_s10 }
   0x9   :  { %p4172_p3 = scmp.ne.s32.totalorder %s24_s10, %s4171_s18  ;;  %p4177_p5 = scmp.lt.s32.totalorder %s4171_s18, %s4171_s18 }
   0xb   :  { %p4178_p6 = por %p4177_p5, %p4176_p4 }
   0xd   :  { %p4179_p7 = pnand %p4178_p6, %p4172_p3 }
   0xf   :  { %4182 = shalt.err (!%p4179_p7)
}
  0x10   :  { %s4210_s19 = smov 64   ;;  %s4211_s20 = smov 4  }
  0x11   :  { %29 = dma.hbm_to_vmem [thread:$0]  %s4621_s1, 25600, %s24_s10, [#allocation3], %s4210_s19, %s4210_s19, %s4211_s20  }
  0x12   :  { %4205 = dma.done.wait [#allocation3], 25600  }
  0x13   :  { %4206 = vsyncadd [#allocation3], 4294941696  ;;  %v3877_v0 = vld [vmem:[#allocation2 + $0x40] sm:$0xff]   ;;  %v3881_v4 = vld [vmem:[#allocation2 + $0x48] sm:$0xff]   ;;  %v4212_v24 = vmov 1983009808   ;;  %v167_v26 = vlaneseq }
  0x14   :  { %v3878_v1 = vld [vmem:[#allocation2] sm:$0xff]   ;;  %3400 = vmatprep.subr.bf16.mxu0 %v3877_v0  ;;  %v3882_v5 = vld [vmem:[#allocation2 + $0x8] sm:$0xff]   ;;  %v3885_v8 = vld [vmem:[#allocation2 + $0x50] sm:$0xff]   ;;  %v165_v25 = vunpack.c.l.s4 %v4212_v24  ;;  %vm4214_vm0 = vmmov 0   ;;  %vm2966_vm5 = vcmask 523264   ;;  %vm3150_vm8 = vcmask 23552  }
  0x15   :  { %v3879_v2 = vld [vmem:[#allocation2 + $0xc0] sm:$0xff]   ;;  %3401 = vmatpush3.bf16.msra.mxu0 %v3878_v1  ;;  %v3883_v6 = vld [vmem:[#allocation2 + $0xc8] sm:$0xff]   ;;  %v3886_v9 = vld [vmem:[#allocation2 + $0x10] sm:$0xff]   ;;  %v168_v32 = vshrl.u32 %v167_v26, 7 }
  0x16   :  { %v3880_v3 = vld [vmem:[#allocation2 + $0x80] sm:$0xff]   ;;  %3422 = vmatprep.subr.bf16.mxu1 %v3879_v2  ;;  %3402 = vmatprep.subr.bf16.mxu0 %v3881_v4  ;;  %v3884_v7 = vld [vmem:[#allocation2 + $0x88] sm:$0xff]   ;;  %v3887_v10 = vld [vmem:[#allocation2 + $0xd0] sm:$0xff]   ;;  %v166_v31 = vunpack.c.0.s8 %v165_v25 }
  0x17   :  { %3423 = vmatpush3.bf16.msra.mxu1 %v3880_v3  ;;  %v3888_v11 = vld [vmem:[#allocation2 + $0x90] sm:$0xff]   ;;  %v3889_v12 = vld [vmem:[#allocation2 + $0x58] sm:$0xff]   ;;  %v3893_v16 = vld [vmem:[#allocation2 + $0x60] sm:$0xff]  }
  0x18   :  { %3424 = vmatprep.subr.bf16.mxu1 %v3883_v6  ;;  %v3890_v13 = vld [vmem:[#allocation2 + $0x18] sm:$0xff]   ;;  %v3894_v17 = vld [vmem:[#allocation2 + $0x20] sm:$0xff]   ;;  %v3897_v20 = vld [vmem:[#allocation2 + $0x68] sm:$0xff]   ;;  %v4280_v36 = vsub.s32 %v166_v31, %v168_v32 }
  0x19   :  { %3403 = vmatpush3.bf16.msra.mxu0 %v3882_v5  ;;  %v3891_v14 = vld [vmem:[#allocation2 + $0xd8] sm:$0xff]   ;;  %v3895_v18 = vld [vmem:[#allocation2 + $0xe0] sm:$0xff]   ;;  %v3898_v21 = vld [vmem:[#allocation2 + $0x28] sm:$0xff]  }
  0x1a   :  { %3404 = vmatprep.subr.bf16.mxu0 %v3885_v8  ;;  %v3892_v15 = vld [vmem:[#allocation2 + $0x98] sm:$0xff]   ;;  %v3896_v19 = vld [vmem:[#allocation2 + $0xa0] sm:$0xff]   ;;  %v3899_v22 = vld [vmem:[#allocation2 + $0xe8] sm:$0xff]  }
  0x1b   :  { %3425 = vmatpush3.bf16.msra.mxu1 %v3884_v7  ;;  %v3900_v23 = vld [vmem:[#allocation2 + $0xa8] sm:$0xff]   ;;  %v3901_v27 = vld [vmem:[#allocation2 + $0x70] sm:$0xff]   ;;  %v3905_v33 = vld [vmem:[#allocation2 + $0x78] sm:$0xff]  }
  0x1c   :  { %3426 = vmatprep.subr.bf16.mxu1 %v3887_v10  ;;  %v3902_v28 = vld [vmem:[#allocation2 + $0x30] sm:$0xff]   ;;  %v3906_v34 = vld [vmem:[#allocation2 + $0x38] sm:$0xff]   ;;  %v3917_v46 = vld [vmem:[#allocation2 + $0x140] sm:$0xff]  }
  0x1d   :  { %3405 = vmatpush3.bf16.msra.mxu0 %v3886_v9  ;;  %v3903_v29 = vld [vmem:[#allocation2 + $0xf0] sm:$0xff]   ;;  %v3907_v35 = vld [vmem:[#allocation2 + $0xf8] sm:$0xff]   ;;  %v3922_v58 = vld [vmem:[#allocation2 + $0x100] sm:$0xff]  }
  0x1e   :  { %3406 = vmatprep.subr.bf16.mxu0 %v3889_v12  ;;  %v3904_v30 = vld [vmem:[#allocation2 + $0xb0] sm:$0xff]   ;;  %v3912_v39 = vld [vmem:[%s4620_s0 + $0xc8] ss:$50 sps:$4 sm:$0xff]   ;;  %v3914_v40 = vld [vmem:[%s4620_s0 + $0x12c] ss:$50 sps:$4 sm:$0xff]  }
  0x1f   :  { %3427 = vmatpush3.bf16.msra.mxu1 %v3888_v11  ;;  %v3908_v37 = vld [vmem:[%s4620_s0] ss:$50 sps:$4 sm:$0xff]   ;;  %v3910_v38 = vld [vmem:[%s4620_s0 + $0x64] ss:$50 sps:$4 sm:$0xff]   ;;  %v403_v44 = vrot.slane %v3912_v39, %v4280_v36  ;;  %v417_v45 = vrot.slane %v3914_v40, %v4280_v36  ;;  %v3919_v48 = vld [vmem:[%s4620_s0 + $0x68] ss:$50 sps:$4 sm:$0xff]  }
  0x20   :  { %3428 = vmatprep.subr.bf16.mxu1 %v3891_v14  ;;  %v170_v41 = vrot.slane %v3908_v37, %v4280_v36  ;;  %v3916_v42 = vld [vmem:[#allocation2 + $0xb8] sm:$0xff]   ;;  %v184_v43 = vrot.slane %v3910_v38, %v4280_v36  ;;  %v3921_v54 = vld [vmem:[%s4620_s0 + $0x130] ss:$50 sps:$4 sm:$0xff]   ;;  %v191_v56 = vrot.slane %v3919_v48, %v4280_v36  ;;  %v3925_v3 = vld [vmem:[#allocation2 + $0x148] sm:$0xff]  }
  0x21   :  { %3407 = vmatpush3.bf16.msra.mxu0 %v3890_v13  ;;  %v3918_v47 = vld [vmem:[%s4620_s0 + $0x4] ss:$50 sps:$4 sm:$0xff]   ;;  %v3920_v49 = vld [vmem:[%s4620_s0 + $0xcc] ss:$50 sps:$4 sm:$0xff]   ;;  %v426_v51 = vcombine.high %v403_v44, %v417_v45  ;;  %v425_v53 = vcombine.low %v403_v44, %v417_v45  ;;  %v424_v61 = vrot.slane %v3921_v54, %v4280_v36 }
  0x22   :  { %3408 = vmatprep.subr.bf16.mxu0 %v3893_v16  ;;  %v193_v50 = vcombine.high %v170_v41, %v184_v43  ;;  %v192_v52 = vcombine.low %v170_v41, %v184_v43  ;;  %v177_v55 = vrot.slane %v3918_v47, %v4280_v36  ;;  %v410_v57 = vrot.slane %v3920_v49, %v4280_v36  ;;  %v3923_v62 = vld [vmem:[#allocation2 + $0x1c0] sm:$0xff]   ;;  %v3926_v7 = vld [vmem:[#allocation2 + $0x108] sm:$0xff]   ;;  %v3929_v9 = vld [vmem:[#allocation2 + $0x150] sm:$0xff]  }
  0x23   :  { %3429 = vmatpush3.bf16.msra.mxu1 %v3892_v15  ;;  %v3924_v4 = vld [vmem:[#allocation2 + $0x180] sm:$0xff]   ;;  %v3927_v8 = vld [vmem:[#allocation2 + $0x1c8] sm:$0xff]   ;;  %v3930_v11 = vld [vmem:[#allocation2 + $0x110] sm:$0xff]  }
  0x24   :  { %3430 = vmatprep.subr.bf16.mxu1 %v3895_v18  ;;  %v677_v59 = vpack.c.bf16 %v426_v51, %v193_v50  ;;  %v676_v60 = vpack.c.bf16 %v425_v53, %v192_v52  ;;  %v195_v63 = vcombine.high %v177_v55, %v191_v56  ;;  %v194_v0 = vcombine.low %v177_v55, %v191_v56  ;;  %v3928_v10 = vld [vmem:[#allocation2 + $0x188] sm:$0xff]   ;;  %v3931_v12 = vld [vmem:[#allocation2 + $0x1d0] sm:$0xff]   ;;  %v3933_v13 = vld [vmem:[#allocation2 + $0x158] sm:$0xff]  }
  0x25   :  { %3409 = vmatpush3.bf16.msra.mxu0 %v3894_v17  ;;  %v428_v1 = vcombine.high %v410_v57, %v424_v61  ;;  %v427_v2 = vcombine.low %v410_v57, %v424_v61  ;;  %v3932_v14 = vld [vmem:[#allocation2 + $0x190] sm:$0xff]   ;;  %v3934_v15 = vld [vmem:[#allocation2 + $0x118] sm:$0xff]   ;;  %v3937_v17 = vld [vmem:[#allocation2 + $0x160] sm:$0xff]  }
  0x26   :  { %3410 = vmatprep.subr.bf16.mxu0 %v3897_v20  ;;  %2340 = vmatprep.mubr.bf16.mxu0 %v677_v59  ;;  %v3935_v16 = vld [vmem:[#allocation2 + $0x1d8] sm:$0xff]   ;;  %v3939_v20 = vld [vmem:[#allocation2 + $0x1e0] sm:$0xff]   ;;  %v3943_v24 = vld [vmem:[#allocation2 + $0x1e8] sm:$0xff]  }
  0x27   :  { %3431 = vmatpush3.bf16.msra.mxu1 %v3896_v19  ;;  %v679_v5 = vpack.c.bf16 %v428_v1, %v195_v63  ;;  %v678_v6 = vpack.c.bf16 %v427_v2, %v194_v0  ;;  %v3936_v18 = vld [vmem:[#allocation2 + $0x198] sm:$0xff]   ;;  %v3938_v19 = vld [vmem:[#allocation2 + $0x120] sm:$0xff]   ;;  %v3945_v25 = vld [vmem:[#allocation2 + $0x170] sm:$0xff]  }
  0x28   :  { %3432 = vmatprep.subr.bf16.mxu1 %v3899_v22  ;;  %v3940_v22 = vld [vmem:[#allocation2 + $0x1a0] sm:$0xff]   ;;  %v3944_v26 = vld [vmem:[#allocation2 + $0x1a8] sm:$0xff]   ;;  %v3950_v31 = vld [vmem:[#allocation2 + $0x138] sm:$0xff]  }
  0x29   :  { %3411 = vmatpush3.bf16.msra.mxu0 %v3898_v21  ;;  %2381 = vmatprep.mubr.bf16.mxu1 %v679_v5  ;;  %v3941_v21 = vld [vmem:[#allocation2 + $0x168] sm:$0xff]   ;;  %v3951_v32 = vld [vmem:[#allocation2 + $0x1f8] sm:$0xff]   ;;  %v3961_v43 = vld [vmem:[#allocation2 + $0x240] sm:$0xff]  }
  0x2a   :  { %3412 = vmatprep.subr.bf16.mxu0 %v3901_v27  ;;  %v3946_v27 = vld [vmem:[#allocation2 + $0x130] sm:$0xff]   ;;  %v3960_v41 = vld [vmem:[#allocation2 + $0x1b8] sm:$0xff]   ;;  %v3967_v56 = vld [vmem:[#allocation2 + $0x2c0] sm:$0xff]  }
  0x2b   :  { %3433 = vmatpush3.bf16.msra.mxu1 %v3900_v23  ;;  %v3942_v23 = vld [vmem:[#allocation2 + $0x128] sm:$0xff]   ;;  %v3963_v45 = vld [vmem:[%s4620_s0 + $0x70] ss:$50 sps:$4 sm:$0xff]  }
  0x2c   :  { %3434 = vmatprep.subr.bf16.mxu1 %v3903_v29  ;;  %v3948_v29 = vld [vmem:[#allocation2 + $0x1b0] sm:$0xff]   ;;  %v3962_v44 = vld [vmem:[%s4620_s0 + $0xc] ss:$50 sps:$4 sm:$0xff]   ;;  %v227_v53 = vrot.slane %v3963_v45, %v4280_v36 }
  0x2d   :  { %3413 = vmatpush3.bf16.msra.mxu0 %v3902_v28  ;;  %v3947_v28 = vld [vmem:[#allocation2 + $0x1f0] sm:$0xff]   ;;  %v3965_v49 = vld [vmem:[%s4620_s0 + $0x138] ss:$50 sps:$4 sm:$0xff]   ;;  %v213_v52 = vrot.slane %v3962_v44, %v4280_v36  ;;  %v3966_v59 = vld [vmem:[#allocation2 + $0x200] sm:$0xff]  }
  0x2e   :  { %3414 = vmatprep.subr.bf16.mxu0 %v3905_v33  ;;  %v3952_v33 = vld [vmem:[%s4620_s0 + $0x8] ss:$50 sps:$4 sm:$0xff]   ;;  %v460_v55 = vrot.slane %v3965_v49, %v4280_v36  ;;  %v3968_v1 = vld [vmem:[#allocation2 + $0x280] sm:$0xff]  }
  0x2f   :  { %3435 = vmatpush3.bf16.msra.mxu1 %v3904_v30  ;;  %v3949_v30 = vld [vmem:[#allocation2 + $0x178] sm:$0xff]   ;;  %v3958_v37 = vld [vmem:[%s4620_s0 + $0x134] ss:$50 sps:$4 sm:$0xff]   ;;  %v206_v38 = vrot.slane %v3952_v33, %v4280_v36 }
  0x30   :  { %3436 = vmatprep.subr.bf16.mxu1 %v3907_v35  ;;  %v3956_v35 = vld [vmem:[%s4620_s0 + $0xd0] ss:$50 sps:$4 sm:$0xff]   ;;  %v3964_v48 = vld [vmem:[%s4620_s0 + $0xd4] ss:$50 sps:$4 sm:$0xff]   ;;  %v4007_v44 = vld [vmem:[%s4620_s0 + $0x78] ss:$50 sps:$4 sm:$0xff]  }
  0x31   :  { %3415 = vmatpush3.bf16.msra.mxu0 %v3906_v34  ;;  %v3954_v34 = vld [vmem:[%s4620_s0 + $0x6c] ss:$50 sps:$4 sm:$0xff]   ;;  %v439_v40 = vrot.slane %v3956_v35, %v4280_v36  ;;  %v446_v54 = vrot.slane %v3964_v48, %v4280_v36 }
  0x32   :  { %3444 = vmatprep.subr.bf16.mxu0 %v3917_v46  ;;  %v220_v39 = vrot.slane %v3954_v34, %v4280_v36  ;;  %v3969_v0 = vld [vmem:[#allocation2 + $0x248] sm:$0xff]  }
  0x33   :  { %3437 = vmatpush3.bf16.msra.mxu1 %v3916_v42  ;;  %v453_v42 = vrot.slane %v3958_v37, %v4280_v36  ;;  %v464_v61 = vcombine.high %v446_v54, %v460_v55  ;;  %v463_v63 = vcombine.low %v446_v54, %v460_v55  ;;  %v3971_v5 = vld [vmem:[#allocation2 + $0x2c8] sm:$0xff]   ;;  %v4004_v37 = vld [vmem:[#allocation2 + $0x2b8] sm:$0xff]  }
  0x34   :  { %3466 = vmatprep.subr.bf16.mxu1 %v3923_v62  ;;  %2341 = vmatmul.mubr.bf16.vlgmr.msra.gmra.mrb[0].mxu0 %v676_v60  ;;  %v229_v46 = vcombine.high %v206_v38, %v220_v39  ;;  %v228_v47 = vcombine.low %v206_v38, %v220_v39  ;;  %v231_v60 = vcombine.high %v213_v52, %v227_v53  ;;  %v4002_v33 = vld [vmem:[%s4620_s0 + $0x13c] ss:$50 sps:$4 sm:$0xff]  }
  0x35   :  { %3445 = vmatpush3.bf16.msra.mxu0 %v3922_v58  ;;  %v462_v50 = vcombine.high %v439_v40, %v453_v42  ;;  %v461_v51 = vcombine.low %v439_v40, %v453_v42  ;;  %v230_v62 = vcombine.low %v213_v52, %v227_v53  ;;  %v489_v39 = vrot.slane %v4002_v33, %v4280_v36  ;;  %v4005_v40 = vld [vmem:[#allocation2 + $0x340] sm:$0xff]   ;;  %v4008_v45 = vld [vmem:[%s4620_s0 + $0xdc] ss:$50 sps:$4 sm:$0xff]  }
  0x36   :  { %3446 = vmatprep.subr.bf16.mxu0 %v3925_v3  ;;  %2382 = vmatmul.mubr.bf16.vlgmr.msra.gmra.mrb[0].mxu1 %v678_v6  ;;  %v683_v2 = vpack.c.bf16 %v464_v61, %v231_v60  ;;  %v3973_v6 = vld [vmem:[#allocation2 + $0x250] sm:$0xff]   ;;  %v4011_v53 = vld [vmem:[#allocation2 + $0x3c0] sm:$0xff]   ;;  %v4013_v61 = vld [vmem:[#allocation2 + $0x348] sm:$0xff]  }
  0x37   :  { %3467 = vmatpush3.bf16.msra.mxu1 %v3924_v4  ;;  %v681_v57 = vpack.c.bf16 %v462_v50, %v229_v46  ;;  %v680_v58 = vpack.c.bf16 %v461_v51, %v228_v47  ;;  %v682_v3 = vpack.c.bf16 %v463_v63, %v230_v62  ;;  %v3970_v4 = vld [vmem:[#allocation2 + $0x208] sm:$0xff]   ;;  %v4009_v46 = vld [vmem:[%s4620_s0 + $0x140] ss:$50 sps:$4 sm:$0xff]   ;;  %v263_v50 = vrot.slane %v4007_v44, %v4280_v36 }
  0x38   :  { %3468 = vmatprep.subr.bf16.mxu1 %v3927_v8  ;;  %2463 = vmatprep.mubr.bf16.mxu1 %v683_v2  ;;  %v3974_v8 = vld [vmem:[#allocation2 + $0x210] sm:$0xff]   ;;  %v482_v51 = vrot.slane %v4008_v45, %v4280_v36  ;;  %v496_v52 = vrot.slane %v4009_v46, %v4280_v36  ;;  %v4012_v62 = vld [vmem:[#allocation2 + $0x380] sm:$0xff]   ;;  %v4015_v2 = vld [vmem:[#allocation2 + $0x3c8] sm:$0xff]  }
  0x39   :  { %3447 = vmatpush3.bf16.msra.mxu0 %v3926_v7  ;;  %2422 = vmatprep.mubr.bf16.mxu0 %v681_v57  ;;  %v3972_v7 = vld [vmem:[#allocation2 + $0x288] sm:$0xff]  }
  0x3a   :  { %3448 = vmatprep.subr.bf16.mxu0 %v3929_v9  ;;  %v3975_v9 = vld [vmem:[#allocation2 + $0x2d0] sm:$0xff]   ;;  %v499_v60 = vcombine.low %v482_v51, %v496_v52  ;;  %v4053_v45 = vld [vmem:[%s4620_s0 + $0x148] ss:$50 sps:$4 sm:$0xff]  }
  0x3b   :  { %3469 = vmatpush3.bf16.msra.mxu1 %v3928_v10  ;;  %v3977_v10 = vld [vmem:[#allocation2 + $0x258] sm:$0xff]  }
  0x3c   :  { %3470 = vmatprep.subr.bf16.mxu1 %v3931_v12  ;;  %v3978_v12 = vld [vmem:[#allocation2 + $0x218] sm:$0xff]  }
  0x3d   :  { %3449 = vmatpush3.bf16.msra.mxu0 %v3930_v11  ;;  %v3976_v11 = vld [vmem:[#allocation2 + $0x290] sm:$0xff]  }
  0x3e   :  { %3450 = vmatprep.subr.bf16.mxu0 %v3933_v13  ;;  %v3979_v13 = vld [vmem:[#allocation2 + $0x2d8] sm:$0xff]  }
  0x3f   :  { %3471 = vmatpush3.bf16.msra.mxu1 %v3932_v14  ;;  %v3981_v14 = vld [vmem:[#allocation2 + $0x260] sm:$0xff]  }
  0x40   :  { %3472 = vmatprep.subr.bf16.mxu1 %v3935_v16  ;;  %v3982_v16 = vld [vmem:[#allocation2 + $0x220] sm:$0xff]  }
  0x41   :  { %3451 = vmatpush3.bf16.msra.mxu0 %v3934_v15  ;;  %v3980_v15 = vld [vmem:[#allocation2 + $0x298] sm:$0xff]  }
  0x42   :  { %3452 = vmatprep.subr.bf16.mxu0 %v3937_v17  ;;  %v3983_v17 = vld [vmem:[#allocation2 + $0x2e0] sm:$0xff]  }
  0x43   :  { %3473 = vmatpush3.bf16.msra.mxu1 %v3936_v18  ;;  %v3985_v18 = vld [vmem:[#allocation2 + $0x268] sm:$0xff]  }
  0x44   :  { %3474 = vmatprep.subr.bf16.mxu1 %v3939_v20  ;;  %v3986_v20 = vld [vmem:[#allocation2 + $0x228] sm:$0xff]  }
  0x45   :  { %3453 = vmatpush3.bf16.msra.mxu0 %v3938_v19  ;;  %v3984_v19 = vld [vmem:[#allocation2 + $0x2a0] sm:$0xff]  }
  0x46   :  { %3454 = vmatprep.subr.bf16.mxu0 %v3941_v21  ;;  %v3987_v21 = vld [vmem:[#allocation2 + $0x2e8] sm:$0xff]  }
  0x47   :  { %3475 = vmatpush3.bf16.msra.mxu1 %v3940_v22  ;;  %v3989_v22 = vld [vmem:[#allocation2 + $0x270] sm:$0xff]  }
  0x48   :  { %3476 = vmatprep.subr.bf16.mxu1 %v3943_v24  ;;  %v3990_v24 = vld [vmem:[#allocation2 + $0x230] sm:$0xff]  }
  0x49   :  { %3455 = vmatpush3.bf16.msra.mxu0 %v3942_v23  ;;  %v3988_v23 = vld [vmem:[#allocation2 + $0x2a8] sm:$0xff]  }
  0x4a   :  { %3456 = vmatprep.subr.bf16.mxu0 %v3945_v25  ;;  %v3991_v25 = vld [vmem:[#allocation2 + $0x2f0] sm:$0xff]  }
  0x4b   :  { %3477 = vmatpush3.bf16.msra.mxu1 %v3944_v26  ;;  %v3992_v26 = vld [vmem:[#allocation2 + $0x2b0] sm:$0xff]  }
  0x4c   :  { %3478 = vmatprep.subr.bf16.mxu1 %v3947_v28  ;;  %v3994_v28 = vld [vmem:[#allocation2 + $0x238] sm:$0xff]  }
  0x4d   :  { %3457 = vmatpush3.bf16.msra.mxu0 %v3946_v27  ;;  %v3993_v27 = vld [vmem:[#allocation2 + $0x278] sm:$0xff]  }
  0x4e   :  { %3458 = vmatprep.subr.bf16.mxu0 %v3949_v30  ;;  %v3996_v30 = vld [vmem:[%s4620_s0 + $0x10] ss:$50 sps:$4 sm:$0xff]  }
  0x4f   :  { %3479 = vmatpush3.bf16.msra.mxu1 %v3948_v29  ;;  %v3995_v29 = vld [vmem:[#allocation2 + $0x2f8] sm:$0xff]   ;;  %v242_v34 = vrot.slane %v3996_v30, %v4280_v36 }
  0x50   :  { %3480 = vmatprep.subr.bf16.mxu1 %v3951_v32  ;;  %v4000_v32 = vld [vmem:[%s4620_s0 + $0xd8] ss:$50 sps:$4 sm:$0xff]  }
  0x51   :  { %3459 = vmatpush3.bf16.msra.mxu0 %v3950_v31  ;;  %v3998_v31 = vld [vmem:[%s4620_s0 + $0x74] ss:$50 sps:$4 sm:$0xff]   ;;  %v475_v38 = vrot.slane %v4000_v32, %v4280_v36  ;;  %v4048_v32 = vld [vmem:[#allocation2 + $0x3b8] sm:$0xff]  }
  0x52   :  { %3488 = vmatprep.subr.bf16.mxu0 %v3961_v43  ;;  %v256_v35 = vrot.slane %v3998_v31, %v4280_v36  ;;  %v4046_v30 = vld [vmem:[%s4620_s0 + $0x144] ss:$50 sps:$4 sm:$0xff]  }
  0x53   :  { %3481 = vmatpush3.bf16.msra.mxu1 %v3960_v41  ;;  %v4006_v41 = vld [vmem:[%s4620_s0 + $0x14] ss:$50 sps:$4 sm:$0xff]   ;;  %v498_v47 = vcombine.high %v475_v38, %v489_v39  ;;  %v497_v48 = vcombine.low %v475_v38, %v489_v39  ;;  %v4050_v38 = vld [vmem:[%s4620_s0 + $0x1c] ss:$50 sps:$4 sm:$0xff]  }
  0x54   :  { %3510 = vmatprep.subr.bf16.mxu1 %v3967_v56  ;;  %2423 = vmatmul.mubr.bf16.vlgmr.msra.gmra.mrb[4].mxu0 %v680_v58  ;;  %v265_v42 = vcombine.high %v242_v34, %v256_v35  ;;  %v264_v43 = vcombine.low %v242_v34, %v256_v35  ;;  %v249_v49 = vrot.slane %v4006_v41, %v4280_v36  ;;  %v4010_v56 = vld [vmem:[#allocation2 + $0x300] sm:$0xff]  }
  0x55   :  { %3489 = vmatpush3.bf16.msra.mxu0 %v3966_v59  ;;  %v500_v58 = vcombine.high %v482_v51, %v496_v52  ;;  %v525_v35 = vrot.slane %v4046_v30, %v4280_v36  ;;  %v4051_v39 = vld [vmem:[%s4620_s0 + $0x80] ss:$50 sps:$4 sm:$0xff]   ;;  %v285_v46 = vrot.slane %v4050_v38, %v4280_v36  ;;  %v532_v52 = vrot.slane %v4053_v45, %v4280_v36 }
  0x56   :  { %3490 = vmatprep.subr.bf16.mxu0 %v3969_v0  ;;  %2464 = vmatmul.mubr.bf16.vlgmr.msra.gmra.mrb[4].mxu1 %v682_v3  ;;  %v685_v54 = vpack.c.bf16 %v498_v47, %v265_v42  ;;  %v684_v55 = vpack.c.bf16 %v497_v48, %v264_v43  ;;  %v267_v57 = vcombine.high %v249_v49, %v263_v50  ;;  %v4017_v3 = vld [vmem:[#allocation2 + $0x350] sm:$0xff]  }
  0x57   :  { %3511 = vmatpush3.bf16.msra.mxu1 %v3968_v1  ;;  %v266_v59 = vcombine.low %v249_v49, %v263_v50  ;;  %v4014_v1 = vld [vmem:[#allocation2 + $0x308] sm:$0xff]   ;;  %v299_v47 = vrot.slane %v4051_v39, %v4280_v36  ;;  %v4054_v49 = vld [vmem:[#allocation2 + $0x400] sm:$0xff]  }
  0x58   :  { %3512 = vmatprep.subr.bf16.mxu1 %v3971_v5  ;;  %2504 = vmatprep.mubr.bf16.mxu0 %v685_v54  ;;  %v687_v63 = vpack.c.bf16 %v500_v58, %v267_v57  ;;  %v4018_v5 = vld [vmem:[#allocation2 + $0x310] sm:$0xff]   ;;  %v4057_v58 = vld [vmem:[#allocation2 + $0x448] sm:$0xff]  }
  0x59   :  { %3491 = vmatpush3.bf16.msra.mxu0 %v3970_v4  ;;  %v686_v0 = vpack.c.bf16 %v499_v60, %v266_v59  ;;  %v4016_v4 = vld [vmem:[#allocation2 + $0x388] sm:$0xff]   ;;  %v303_v54 = vcombine.high %v285_v46, %v299_v47  ;;  %v4056_v59 = vld [vmem:[#allocation2 + $0x480] sm:$0xff]  }
  0x5a   :  { %3492 = vmatprep.subr.bf16.mxu0 %v3973_v6  ;;  %2545 = vmatprep.mubr.bf16.mxu1 %v687_v63  ;;  %v4019_v6 = vld [vmem:[#allocation2 + $0x3d0] sm:$0xff]   ;;  %v4059_v63 = vld [vmem:[#allocation2 + $0x4c8] sm:$0xff]  }
  0x5b   :  { %3513 = vmatpush3.bf16.msra.mxu1 %v3972_v7  ;;  %v4021_v7 = vld [vmem:[#allocation2 + $0x358] sm:$0xff]  }
  0x5c   :  { %3514 = vmatprep.subr.bf16.mxu1 %v3975_v9  ;;  %v4022_v9 = vld [vmem:[#allocation2 + $0x318] sm:$0xff]  }
  0x5d   :  { %3493 = vmatpush3.bf16.msra.mxu0 %v3974_v8  ;;  %v4020_v8 = vld [vmem:[#allocation2 + $0x390] sm:$0xff]   ;;  %v4096_v39 = vld [vmem:[%s4620_s0 + $0xec] ss:$50 sps:$4 sm:$0xff]  }
  0x5e   :  { %3494 = vmatprep.subr.bf16.mxu0 %v3977_v10  ;;  %v4023_v10 = vld [vmem:[#allocation2 + $0x3d8] sm:$0xff]   ;;  %v554_v45 = vrot.slane %v4096_v39, %v4280_v36 }
  0x5f   :  { %3515 = vmatpush3.bf16.msra.mxu1 %v3976_v11  ;;  %v4025_v11 = vld [vmem:[#allocation2 + $0x360] sm:$0xff]  }
  0x60   :  { %3516 = vmatprep.subr.bf16.mxu1 %v3979_v13  ;;  %v4026_v13 = vld [vmem:[#allocation2 + $0x320] sm:$0xff]  }
  0x61   :  { %3495 = vmatpush3.bf16.msra.mxu0 %v3978_v12  ;;  %v4024_v12 = vld [vmem:[#allocation2 + $0x398] sm:$0xff]  }
  0x62   :  { %3496 = vmatprep.subr.bf16.mxu0 %v3981_v14  ;;  %v4027_v14 = vld [vmem:[#allocation2 + $0x3e0] sm:$0xff]  }
  0x63   :  { %3517 = vmatpush3.bf16.msra.mxu1 %v3980_v15  ;;  %v4029_v15 = vld [vmem:[#allocation2 + $0x368] sm:$0xff]  }
  0x64   :  { %3518 = vmatprep.subr.bf16.mxu1 %v3983_v17  ;;  %v4030_v17 = vld [vmem:[#allocation2 + $0x328] sm:$0xff]  }
  0x65   :  { %3497 = vmatpush3.bf16.msra.mxu0 %v3982_v16  ;;  %v4028_v16 = vld [vmem:[#allocation2 + $0x3a0] sm:$0xff]  }
  0x66   :  { %3498 = vmatprep.subr.bf16.mxu0 %v3985_v18  ;;  %v4031_v18 = vld [vmem:[#allocation2 + $0x3e8] sm:$0xff]  }
  0x67   :  { %3519 = vmatpush3.bf16.msra.mxu1 %v3984_v19  ;;  %v4033_v19 = vld [vmem:[#allocation2 + $0x370] sm:$0xff]  }
  0x68   :  { %3520 = vmatprep.subr.bf16.mxu1 %v3987_v21  ;;  %v4034_v21 = vld [vmem:[#allocation2 + $0x330] sm:$0xff]  }
  0x69   :  { %3499 = vmatpush3.bf16.msra.mxu0 %v3986_v20  ;;  %v4032_v20 = vld [vmem:[#allocation2 + $0x3a8] sm:$0xff]  }
  0x6a   :  { %3500 = vmatprep.subr.bf16.mxu0 %v3989_v22  ;;  %v4035_v22 = vld [vmem:[#allocation2 + $0x3f0] sm:$0xff]  }
  0x6b   :  { %3521 = vmatpush3.bf16.msra.mxu1 %v3988_v23  ;;  %v4036_v23 = vld [vmem:[#allocation2 + $0x3b0] sm:$0xff]  }
  0x6c   :  { %3522 = vmatprep.subr.bf16.mxu1 %v3991_v25  ;;  %v4038_v25 = vld [vmem:[#allocation2 + $0x338] sm:$0xff]  }
  0x6d   :  { %3501 = vmatpush3.bf16.msra.mxu0 %v3990_v24  ;;  %v4037_v24 = vld [vmem:[#allocation2 + $0x378] sm:$0xff]  }
  0x6e   :  { %3502 = vmatprep.subr.bf16.mxu0 %v3993_v27  ;;  %v4040_v27 = vld [vmem:[%s4620_s0 + $0x18] ss:$50 sps:$4 sm:$0xff]  }
  0x6f   :  { %3523 = vmatpush3.bf16.msra.mxu1 %v3992_v26  ;;  %v4039_v26 = vld [vmem:[#allocation2 + $0x3f8] sm:$0xff]   ;;  %v278_v31 = vrot.slane %v4040_v27, %v4280_v36 }
  0x70   :  { %3524 = vmatprep.subr.bf16.mxu1 %v3995_v29  ;;  %v4044_v29 = vld [vmem:[%s4620_s0 + $0xe0] ss:$50 sps:$4 sm:$0xff]  }
  0x71   :  { %3503 = vmatpush3.bf16.msra.mxu0 %v3994_v28  ;;  %v4042_v28 = vld [vmem:[%s4620_s0 + $0x7c] ss:$50 sps:$4 sm:$0xff]   ;;  %v511_v34 = vrot.slane %v4044_v29, %v4280_v36 }
  0x72   :  { %3532 = vmatprep.subr.bf16.mxu0 %v4005_v40  ;;  %v292_v33 = vrot.slane %v4042_v28, %v4280_v36  ;;  %v4052_v40 = vld [vmem:[%s4620_s0 + $0xe4] ss:$50 sps:$4 sm:$0xff]   ;;  %v4090_v27 = vld [vmem:[%s4620_s0 + $0x14c] ss:$50 sps:$4 sm:$0xff]  }
  0x73   :  { %3525 = vmatpush3.bf16.msra.mxu1 %v4004_v37  ;;  %v4049_v37 = vld [vmem:[#allocation2 + $0x440] sm:$0xff]   ;;  %v534_v42 = vcombine.high %v511_v34, %v525_v35  ;;  %v533_v44 = vcombine.low %v511_v34, %v525_v35  ;;  %v518_v48 = vrot.slane %v4052_v40, %v4280_v36  ;;  %v4095_v35 = vld [vmem:[%s4620_s0 + $0x88] ss:$50 sps:$4 sm:$0xff]  }
  0x74   :  { %3554 = vmatprep.subr.bf16.mxu1 %v4011_v53  ;;  %2505 = vmatmul.mubr.bf16.vlgmr.msra.gmra.mrb[8].mxu0 %v684_v55  ;;  %v301_v41 = vcombine.high %v278_v31, %v292_v33  ;;  %v300_v43 = vcombine.low %v278_v31, %v292_v33  ;;  %v4055_v53 = vld [vmem:[#allocation2 + $0x4c0] sm:$0xff]   ;;  %v302_v55 = vcombine.low %v285_v46, %v299_v47  ;;  %v4092_v31 = vld [vmem:[#allocation2 + $0x4b8] sm:$0xff]  }
  0x75   :  { %3533 = vmatpush3.bf16.msra.mxu0 %v4010_v56  ;;  %v536_v56 = vcombine.high %v518_v48, %v532_v52  ;;  %v535_v57 = vcombine.low %v518_v48, %v532_v52  ;;  %v4093_v33 = vld [vmem:[#allocation2 + $0x540] sm:$0xff]  }
  0x76   :  { %3534 = vmatprep.subr.bf16.mxu0 %v4013_v61  ;;  %2546 = vmatmul.mubr.bf16.vlgmr.msra.gmra.mrb[8].mxu1 %v686_v0  ;;  %v689_v50 = vpack.c.bf16 %v534_v42, %v301_v41  ;;  %v688_v51 = vpack.c.bf16 %v533_v44, %v300_v43  ;;  %v4061_v0 = vld [vmem:[#allocation2 + $0x450] sm:$0xff]   ;;  %v335_v44 = vrot.slane %v4095_v35, %v4280_v36  ;;  %v4099_v47 = vld [vmem:[#allocation2 + $0x5c0] sm:$0xff]  }
  0x77   :  { %3555 = vmatpush3.bf16.msra.mxu1 %v4012_v62  ;;  %v691_v60 = vpack.c.bf16 %v536_v56, %v303_v54  ;;  %v690_v61 = vpack.c.bf16 %v535_v57, %v302_v55  ;;  %v4058_v62 = vld [vmem:[#allocation2 + $0x408] sm:$0xff]   ;;  %v4094_v34 = vld [vmem:[%s4620_s0 + $0x24] ss:$50 sps:$4 sm:$0xff]  }
  0x78   :  { %3556 = vmatprep.subr.bf16.mxu1 %v4015_v2  ;;  %2586 = vmatprep.mubr.bf16.mxu0 %v689_v50  ;;  %v4062_v2 = vld [vmem:[#allocation2 + $0x410] sm:$0xff]   ;;  %v321_v43 = vrot.slane %v4094_v34, %v4280_v36  ;;  %v4098_v50 = vld [vmem:[#allocation2 + $0x500] sm:$0xff]   ;;  %v4101_v55 = vld [vmem:[#allocation2 + $0x548] sm:$0xff]  }
  0x79   :  { %3535 = vmatpush3.bf16.msra.mxu0 %v4014_v1  ;;  %2627 = vmatprep.mubr.bf16.mxu1 %v691_v60  ;;  %v4060_v1 = vld [vmem:[#allocation2 + $0x488] sm:$0xff]   ;;  %v4097_v40 = vld [vmem:[%s4620_s0 + $0x150] ss:$50 sps:$4 sm:$0xff]  }
  0x7a   :  { %3536 = vmatprep.subr.bf16.mxu0 %v4017_v3  ;;  %v4063_v3 = vld [vmem:[#allocation2 + $0x4d0] sm:$0xff]   ;;  %v568_v46 = vrot.slane %v4097_v40, %v4280_v36  ;;  %v4100_v56 = vld [vmem:[#allocation2 + $0x580] sm:$0xff]   ;;  %v4103_v60 = vld [vmem:[#allocation2 + $0x5c8] sm:$0xff]  }
  0x7b   :  { %3557 = vmatpush3.bf16.msra.mxu1 %v4016_v4  ;;  %v4065_v4 = vld [vmem:[#allocation2 + $0x458] sm:$0xff]  }
  0x7c   :  { %3558 = vmatprep.subr.bf16.mxu1 %v4019_v6  ;;  %v4066_v6 = vld [vmem:[#allocation2 + $0x418] sm:$0xff]   ;;  %v572_v52 = vcombine.high %v554_v45, %v568_v46  ;;  %v571_v54 = vcombine.low %v554_v45, %v568_v46 }
  0x7d   :  { %3537 = vmatpush3.bf16.msra.mxu0 %v4018_v5  ;;  %v4064_v5 = vld [vmem:[#allocation2 + $0x490] sm:$0xff]   ;;  %v4140_v34 = vld [vmem:[%s4620_s0 + $0x158] ss:$50 sps:$4 sm:$0xff]  }
  0x7e   :  { %3538 = vmatprep.subr.bf16.mxu0 %v4021_v7  ;;  %v4067_v7 = vld [vmem:[#allocation2 + $0x4d8] sm:$0xff]  }
  0x7f   :  { %3559 = vmatpush3.bf16.msra.mxu1 %v4020_v8  ;;  %v4069_v8 = vld [vmem:[#allocation2 + $0x460] sm:$0xff]  }
  0x80   :  { %3560 = vmatprep.subr.bf16.mxu1 %v4023_v10  ;;  %v4070_v10 = vld [vmem:[#allocation2 + $0x420] sm:$0xff]  }
  0x81   :  { %3539 = vmatpush3.bf16.msra.mxu0 %v4022_v9  ;;  %v4068_v9 = vld [vmem:[#allocation2 + $0x498] sm:$0xff]  }
  0x82   :  { %3540 = vmatprep.subr.bf16.mxu0 %v4025_v11  ;;  %v4071_v11 = vld [vmem:[#allocation2 + $0x4e0] sm:$0xff]  }
  0x83   :  { %3561 = vmatpush3.bf16.msra.mxu1 %v4024_v12  ;;  %v4073_v12 = vld [vmem:[#allocation2 + $0x468] sm:$0xff]  }
  0x84   :  { %3562 = vmatprep.subr.bf16.mxu1 %v4027_v14  ;;  %v4074_v14 = vld [vmem:[#allocation2 + $0x428] sm:$0xff]  }
  0x85   :  { %3541 = vmatpush3.bf16.msra.mxu0 %v4026_v13  ;;  %v4072_v13 = vld [vmem:[#allocation2 + $0x4a0] sm:$0xff]  }
  0x86   :  { %3542 = vmatprep.subr.bf16.mxu0 %v4029_v15  ;;  %v4075_v15 = vld [vmem:[#allocation2 + $0x4e8] sm:$0xff]  }
  0x87   :  { %3563 = vmatpush3.bf16.msra.mxu1 %v4028_v16  ;;  %v4077_v16 = vld [vmem:[#allocation2 + $0x470] sm:$0xff]  }
  0x88   :  { %3564 = vmatprep.subr.bf16.mxu1 %v4031_v18  ;;  %v4078_v18 = vld [vmem:[#allocation2 + $0x430] sm:$0xff]  }
  0x89   :  { %3543 = vmatpush3.bf16.msra.mxu0 %v4030_v17  ;;  %v4076_v17 = vld [vmem:[#allocation2 + $0x4a8] sm:$0xff]  }
  0x8a   :  { %3544 = vmatprep.subr.bf16.mxu0 %v4033_v19  ;;  %v4079_v19 = vld [vmem:[#allocation2 + $0x4f0] sm:$0xff]  }
  0x8b   :  { %3565 = vmatpush3.bf16.msra.mxu1 %v4032_v20  ;;  %v4080_v20 = vld [vmem:[#allocation2 + $0x4b0] sm:$0xff]  }
  0x8c   :  { %3566 = vmatprep.subr.bf16.mxu1 %v4035_v22  ;;  %v4082_v22 = vld [vmem:[#allocation2 + $0x438] sm:$0xff]  }
  0x8d   :  { %3545 = vmatpush3.bf16.msra.mxu0 %v4034_v21  ;;  %v4081_v21 = vld [vmem:[#allocation2 + $0x478] sm:$0xff]  }
  0x8e   :  { %3546 = vmatprep.subr.bf16.mxu0 %v4037_v24  ;;  %v4084_v24 = vld [vmem:[%s4620_s0 + $0x20] ss:$50 sps:$4 sm:$0xff]  }
  0x8f   :  { %3567 = vmatpush3.bf16.msra.mxu1 %v4036_v23  ;;  %v4083_v23 = vld [vmem:[#allocation2 + $0x4f8] sm:$0xff]   ;;  %v314_v28 = vrot.slane %v4084_v24, %v4280_v36  ;;  %v4134_v24 = vld [vmem:[%s4620_s0 + $0x154] ss:$50 sps:$4 sm:$0xff]  }
  0x90   :  { %3568 = vmatprep.subr.bf16.mxu1 %v4039_v26  ;;  %v4088_v26 = vld [vmem:[%s4620_s0 + $0xe8] ss:$50 sps:$4 sm:$0xff]  }
  0x91   :  { %3547 = vmatpush3.bf16.msra.mxu0 %v4038_v25  ;;  %v4086_v25 = vld [vmem:[%s4620_s0 + $0x84] ss:$50 sps:$4 sm:$0xff]   ;;  %v547_v30 = vrot.slane %v4088_v26, %v4280_v36 }
  0x92   :  { %3576 = vmatprep.subr.bf16.mxu0 %v4049_v37  ;;  %v328_v29 = vrot.slane %v4086_v25, %v4280_v36 }
  0x93   :  { %3569 = vmatpush3.bf16.msra.mxu1 %v4048_v32  ;;  %v561_v32 = vrot.slane %v4090_v27, %v4280_v36  ;;  %v4136_v27 = vld [vmem:[#allocation2 + $0x5b8] sm:$0xff]  }
  0x94   :  { %3598 = vmatprep.subr.bf16.mxu1 %v4055_v53  ;;  %2587 = vmatmul.mubr.bf16.vlgmr.msra.gmra.mrb[12].mxu0 %v688_v51  ;;  %v337_v37 = vcombine.high %v314_v28, %v328_v29  ;;  %v336_v38 = vcombine.low %v314_v28, %v328_v29  ;;  %v339_v51 = vcombine.high %v321_v43, %v335_v44  ;;  %v4137_v28 = vld [vmem:[%s4620_s0 + $0x2c] ss:$50 sps:$4 sm:$0xff]  }
  0x95   :  { %3577 = vmatpush3.bf16.msra.mxu0 %v4054_v49  ;;  %v570_v41 = vcombine.high %v547_v30, %v561_v32  ;;  %v569_v42 = vcombine.low %v547_v30, %v561_v32  ;;  %v338_v53 = vcombine.low %v321_v43, %v335_v44  ;;  %v597_v30 = vrot.slane %v4134_v24, %v4280_v36  ;;  %v4138_v32 = vld [vmem:[%s4620_s0 + $0x90] ss:$50 sps:$4 sm:$0xff]  }
  0x96   :  { %3578 = vmatprep.subr.bf16.mxu0 %v4057_v58  ;;  %2628 = vmatmul.mubr.bf16.vlgmr.msra.gmra.mrb[12].mxu1 %v690_v61  ;;  %v695_v57 = vpack.c.bf16 %v572_v52, %v339_v51  ;;  %v4105_v61 = vld [vmem:[#allocation2 + $0x550] sm:$0xff]   ;;  %v604_v43 = vrot.slane %v4140_v34, %v4280_v36 }
  0x97   :  { %3599 = vmatpush3.bf16.msra.mxu1 %v4056_v59  ;;  %v693_v48 = vpack.c.bf16 %v570_v41, %v337_v37  ;;  %v692_v49 = vpack.c.bf16 %v569_v42, %v336_v38  ;;  %v694_v58 = vpack.c.bf16 %v571_v54, %v338_v53  ;;  %v4102_v59 = vld [vmem:[#allocation2 + $0x508] sm:$0xff]   ;;  %v357_v38 = vrot.slane %v4137_v28, %v4280_v36  ;;  %v4143_v54 = vld [vmem:[#allocation2 + $0x610] sm:$0xff]  }
  0x98   :  { %3600 = vmatprep.subr.bf16.mxu1 %v4059_v63  ;;  %2709 = vmatprep.mubr.bf16.mxu1 %v695_v57  ;;  %v4106_v63 = vld [vmem:[#allocation2 + $0x510] sm:$0xff]   ;;  %v371_v41 = vrot.slane %v4138_v32, %v4280_v36  ;;  %v4142_v53 = vld [vmem:[#allocation2 + $0x608] sm:$0xff]  }
  0x99   :  { %3579 = vmatpush3.bf16.msra.mxu0 %v4058_v62  ;;  %2668 = vmatprep.mubr.bf16.mxu0 %v693_v48  ;;  %v4104_v62 = vld [vmem:[#allocation2 + $0x588] sm:$0xff]   ;;  %v4149_v57 = vld [vmem:[%s4620_s0 + $0x30] ss:$50 sps:$4 sm:$0x33]  }
  0x9a   :  { %3580 = vmatprep.subr.bf16.mxu0 %v4061_v0  ;;  %v4107_v0 = vld [vmem:[#allocation2 + $0x5d0] sm:$0xff]   ;;  %v375_v46 = vcombine.high %v357_v38, %v371_v41  ;;  %v374_v48 = vcombine.low %v357_v38, %v371_v41  ;;  %v2848_v41 = vld [vmem:[%s4623_s3 + $0x8] sm:$0xff] }
  0x9b   :  { %3601 = vmatpush3.bf16.msra.mxu1 %v4060_v1  ;;  %v4109_v1 = vld [vmem:[#allocation2 + $0x558] sm:$0xff]  }
  0x9c   :  { %3602 = vmatprep.subr.bf16.mxu1 %v4063_v3  ;;  %v4110_v3 = vld [vmem:[#allocation2 + $0x518] sm:$0xff]  }
  0x9d   :  { %3581 = vmatpush3.bf16.msra.mxu0 %v4062_v2  ;;  %v4108_v2 = vld [vmem:[#allocation2 + $0x590] sm:$0xff]  }
  0x9e   :  { %3582 = vmatprep.subr.bf16.mxu0 %v4065_v4  ;;  %v4111_v4 = vld [vmem:[#allocation2 + $0x5d8] sm:$0xff]  }
  0x9f   :  { %3603 = vmatpush3.bf16.msra.mxu1 %v4064_v5  ;;  %v4113_v5 = vld [vmem:[#allocation2 + $0x560] sm:$0xff]  }
  0xa0   :  { %3604 = vmatprep.subr.bf16.mxu1 %v4067_v7  ;;  %v4114_v7 = vld [vmem:[#allocation2 + $0x520] sm:$0xff]  }
  0xa1   :  { %3583 = vmatpush3.bf16.msra.mxu0 %v4066_v6  ;;  %v4112_v6 = vld [vmem:[#allocation2 + $0x598] sm:$0xff]  }
  0xa2   :  { %3584 = vmatprep.subr.bf16.mxu0 %v4069_v8  ;;  %v4115_v8 = vld [vmem:[#allocation2 + $0x5e0] sm:$0xff]  }
  0xa3   :  { %3605 = vmatpush3.bf16.msra.mxu1 %v4068_v9  ;;  %v4117_v9 = vld [vmem:[#allocation2 + $0x568] sm:$0xff]  }
  0xa4   :  { %3606 = vmatprep.subr.bf16.mxu1 %v4071_v11  ;;  %v4118_v11 = vld [vmem:[#allocation2 + $0x528] sm:$0xff]  }
  0xa5   :  { %3585 = vmatpush3.bf16.msra.mxu0 %v4070_v10  ;;  %v4116_v10 = vld [vmem:[#allocation2 + $0x5a0] sm:$0xff]  }
  0xa6   :  { %3586 = vmatprep.subr.bf16.mxu0 %v4073_v12  ;;  %v4119_v12 = vld [vmem:[#allocation2 + $0x5e8] sm:$0xff]  }
  0xa7   :  { %3607 = vmatpush3.bf16.msra.mxu1 %v4072_v13  ;;  %v4121_v13 = vld [vmem:[#allocation2 + $0x570] sm:$0xff]  }
  0xa8   :  { %3608 = vmatprep.subr.bf16.mxu1 %v4075_v15  ;;  %v4122_v15 = vld [vmem:[#allocation2 + $0x530] sm:$0xff]  }
  0xa9   :  { %3587 = vmatpush3.bf16.msra.mxu0 %v4074_v14  ;;  %v4120_v14 = vld [vmem:[#allocation2 + $0x5a8] sm:$0xff]  }
  0xaa   :  { %3588 = vmatprep.subr.bf16.mxu0 %v4077_v16  ;;  %v4123_v16 = vld [vmem:[#allocation2 + $0x5f0] sm:$0xff]  }
  0xab   :  { %3609 = vmatpush3.bf16.msra.mxu1 %v4076_v17  ;;  %v4124_v17 = vld [vmem:[#allocation2 + $0x5b0] sm:$0xff]  }
  0xac   :  { %3610 = vmatprep.subr.bf16.mxu1 %v4079_v19  ;;  %v4126_v19 = vld [vmem:[#allocation2 + $0x538] sm:$0xff]  }
  0xad   :  { %3589 = vmatpush3.bf16.msra.mxu0 %v4078_v18  ;;  %v4125_v18 = vld [vmem:[#allocation2 + $0x578] sm:$0xff]  }
  0xae   :  { %3590 = vmatprep.subr.bf16.mxu0 %v4081_v21  ;;  %v4128_v21 = vld [vmem:[%s4620_s0 + $0x28] ss:$50 sps:$4 sm:$0xff]  }
  0xaf   :  { %3611 = vmatpush3.bf16.msra.mxu1 %v4080_v20  ;;  %v4127_v20 = vld [vmem:[#allocation2 + $0x5f8] sm:$0xff]   ;;  %v350_v25 = vrot.slane %v4128_v21, %v4280_v36 }
  0xb0   :  { %3612 = vmatprep.subr.bf16.mxu1 %v4083_v23  ;;  %v4132_v23 = vld [vmem:[%s4620_s0 + $0xf0] ss:$50 sps:$4 sm:$0xff]  }
  0xb1   :  { %3591 = vmatpush3.bf16.msra.mxu0 %v4082_v22  ;;  %v4130_v22 = vld [vmem:[%s4620_s0 + $0x8c] ss:$50 sps:$4 sm:$0xff]   ;;  %v583_v29 = vrot.slane %v4132_v23, %v4280_v36 }
  0xb2   :  { %3620 = vmatprep.subr.bf16.mxu0 %v4093_v33  ;;  %v364_v26 = vrot.slane %v4130_v22, %v4280_v36  ;;  %v4139_v33 = vld [vmem:[%s4620_s0 + $0xf4] ss:$50 sps:$4 sm:$0xff]  }
  0xb3   :  { %3613 = vmatpush3.bf16.msra.mxu1 %v4092_v31  ;;  %v4213_v31 = vmov 0.0   ;;  %v606_v39 = vcombine.high %v583_v29, %v597_v30  ;;  %v605_v40 = vcombine.low %v583_v29, %v597_v30  ;;  %v590_v42 = vrot.slane %v4139_v33, %v4280_v36 }
  0xb4   :  { %3642 = vmatprep.subr.bf16.mxu1 %v4099_v47  ;;  %2669 = vmatmul.mubr.bf16.vlgmr.msra.gmra.mrb[16].mxu0 %v692_v49  ;;  %v373_v35 = vcombine.high %v350_v25, %v364_v26  ;;  %v372_v37 = vcombine.low %v350_v25, %v364_v26  ;;  %v4141_v47 = vld [vmem:[#allocation2 + $0x600] sm:$0xff]  }
  0xb5   :  { %3621 = vmatpush3.bf16.msra.mxu0 %v4098_v50  ;;  %v608_v49 = vcombine.high %v590_v42, %v604_v43  ;;  %v607_v50 = vcombine.low %v590_v42, %v604_v43  ;;  %v2849_v43 = vld [vmem:[%s4623_s3 + $0x10] sm:$0xff] }
  0xb6   :  { %3622 = vmatprep.subr.bf16.mxu0 %v4101_v55  ;;  %2710 = vmatmul.mubr.bf16.vlgmr.msra.gmra.mrb[16].mxu1 %v694_v58  ;;  %v697_v44 = vpack.c.bf16 %v606_v39, %v373_v35  ;;  %v696_v45 = vpack.c.bf16 %v605_v40, %v372_v37  ;;  %v4144_v55 = vld [vmem:[#allocation2 + $0x618] sm:$0xff]   ;;  %v4150_v58 = vld [vmem:[%s4620_s0 + $0x94] ss:$50 sps:$4 sm:$0x33]  }
  0xb7   :  { %3643 = vmatpush3.bf16.msra.mxu1 %v4100_v56  ;;  %v699_v51 = vpack.c.bf16 %v608_v49, %v375_v46  ;;  %v698_v52 = vpack.c.bf16 %v607_v50, %v374_v48  ;;  %v4145_v56 = vld [vmem:[#allocation2 + $0x620] sm:$0xff]   ;;  %v2853_v49 = vld [vmem:[%s4623_s3 + $0x30] sm:$0xff]  ;;  %v2854_v50 = vld [vmem:[%s4623_s3 + $0x38] sm:$0xff] }
  0xb8   :  { %3644 = vmatprep.subr.bf16.mxu1 %v4103_v60  ;;  %2750 = vmatprep.mubr.bf16.mxu0 %v697_v44  ;;  %v4152_v60 = vld [vmem:[%s4620_s0 + $0x15c] ss:$50 sps:$4 sm:$0x33]   ;;  %v2847_v40 = vld [vmem:[%s4623_s3] sm:$0xff] }
  0xb9   :  { %3623 = vmatpush3.bf16.msra.mxu0 %v4102_v59  ;;  %2791 = vmatprep.mubr.bf16.mxu1 %v699_v51  ;;  %v4151_v59 = vld [vmem:[%s4620_s0 + $0xf8] ss:$50 sps:$4 sm:$0x33]   ;;  %v3804_v42 = vpack.c.bf16 %v2848_v41, %v2847_v40  ;;  %v2851_v46 = vld [vmem:[%s4623_s3 + $0x20] sm:$0xff]  ;;  %v3816_v51 = vpack.c.bf16 %v2854_v50, %v2853_v49 }
  0xba   :  { %3624 = vmatprep.subr.bf16.mxu0 %v4105_v61  ;;  %v4146_v61 = vld [vmem:[#allocation2 + $0x628] sm:$0xff]   ;;  %v2850_v44 = vld [vmem:[%s4623_s3 + $0x18] sm:$0xff] }
  0xbb   :  { %3645 = vmatpush3.bf16.msra.mxu1 %v4104_v62  ;;  %v384_v62 = vrot.slane %v4149_v57, %v4280_v36 }
  0xbc   :  { %3646 = vmatprep.subr.bf16.mxu1 %v4107_v0  ;;  %v617_v0 = vrot.slane %v4151_v59, %v4280_v36 }
  0xbd   :  { %3625 = vmatpush3.bf16.msra.mxu0 %v4106_v63  ;;  %v391_v63 = vrot.slane %v4150_v58, %v4280_v36 }
  0xbe   :  { %3626 = vmatprep.subr.bf16.mxu0 %v4109_v1  ;;  %v624_v1 = vrot.slane %v4152_v60, %v4280_v36 }
  0xbf   :  { %3647 = vmatpush3.bf16.msra.mxu1 %v4108_v2  ;;  %v4147_v2 = vld [vmem:[#allocation2 + $0x630] sm:$0xff]  }
  0xc0   :  { %3648 = vmatprep.subr.bf16.mxu1 %v4111_v4  ;;  %v625_v4 = vcombine.low %v617_v0, %v624_v1  ;;  %v2857_v0 = vld [vmem:[%s4623_s3 + $0x50] sm:$0xff]  ;;  %v2858_v1 = vld [vmem:[%s4623_s3 + $0x58] sm:$0xff] }
  0xc1   :  { %3627 = vmatpush3.bf16.msra.mxu0 %v4110_v3  ;;  %v392_v3 = vcombine.low %v384_v62, %v391_v63 }
  0xc2   :  { %3628 = vmatprep.subr.bf16.mxu0 %v4113_v5 }
  0xc3   :  { %3649 = vmatpush3.bf16.msra.mxu1 %v4112_v6  ;;  %v4148_v6 = vld [vmem:[#allocation2 + $0x638] sm:$0xff]  }
  0xc4   :  { %3650 = vmatprep.subr.bf16.mxu1 %v4115_v8 }
  0xc5   :  { %3629 = vmatpush3.bf16.msra.mxu0 %v4114_v7  ;;  %v3192_v7 = vld [vmem:[%s4622_s2] ss:$0 sm:$0xff] }
  0xc6   :  { %3630 = vmatprep.subr.bf16.mxu0 %v4117_v9 }
  0xc7   :  { %3651 = vmatpush3.bf16.msra.mxu1 %v4116_v10 }
  0xc8   :  { %3652 = vmatprep.subr.bf16.mxu1 %v4119_v12  ;;  %v700_v12 = vpack.c.bf16 %v625_v4, %v392_v3 }
  0xc9   :  { %3631 = vmatpush3.bf16.msra.mxu0 %v4118_v11 }
  0xca   :  { %3632 = vmatprep.subr.bf16.mxu0 %v4121_v13 }
  0xcb   :  { %3653 = vmatpush3.bf16.msra.mxu1 %v4120_v14 }
  0xcc   :  { %3654 = vmatprep.subr.bf16.mxu1 %v4123_v16 }
  0xcd   :  { %3633 = vmatpush3.bf16.msra.mxu0 %v4122_v15 }
  0xce   :  { %3634 = vmatprep.subr.bf16.mxu0 %v4125_v18 }
  0xcf   :  { %3655 = vmatpush3.bf16.msra.mxu1 %v4124_v17 }
  0xd0   :  { %3656 = vmatprep.subr.bf16.mxu1 %v4127_v20 }
  0xd1   :  { %3635 = vmatpush3.bf16.msra.mxu0 %v4126_v19 }
  0xd2   :  { %3711 = vmatprep.subr.bf16.mxu0 %v4213_v31 }
  0xd3   :  { %3657 = vmatpush3.bf16.msra.mxu1 %v4136_v27 }
  0xd4   :  { %2751 = vmatmul.mubr.bf16.vlgmr.msra.gmra.mrb[20].mxu0 %v696_v45  ;;  %v3808_v45 = vpack.c.bf16 %v2850_v44, %v2849_v43  ;;  %3805 = vmatprep.subr.bf16.mxu1 %v3804_v42 }
  0xd5   :  { %3712 = vmatpush3.bf16.msra.mxu0 %v4141_v47  ;;  %3727 = vmatprep.mubr.msk.bf16.mxu0 %vm4214_vm0, %v4213_v31  ;;  %v2852_v47 = vld [vmem:[%s4623_s3 + $0x28] sm:$0xff] }
  0xd6   :  { %3713 = vmatprep.subr.bf16.mxu0 %v4213_v31  ;;  %2792 = vmatmul.mubr.bf16.vlgmr.msra.gmra.mrb[20].mxu1 %v698_v52  ;;  %v3812_v48 = vpack.c.bf16 %v2852_v47, %v2851_v46 }
  0xd7   :  { %3807 = vmatpush3.bf16.msra.mxu1 %v3804_v42 }
  0xd8   :  { %3809 = vmatprep.subr.bf16.mxu1 %v3808_v45 }
  0xd9   :  { %3714 = vmatpush3.bf16.msra.mxu0 %v4142_v53  ;;  %v2855_v53 = vld [vmem:[%s4623_s3 + $0x40] sm:$0xff] }
  0xda   :  { %3715 = vmatprep.subr.bf16.mxu0 %v4213_v31 }
  0xdb   :  { %3811 = vmatpush3.bf16.msra.mxu1 %v3808_v45 }
  0xdc   :  { %3813 = vmatprep.subr.bf16.mxu1 %v3812_v48 }
  0xdd   :  { %3716 = vmatpush3.bf16.msra.mxu0 %v4143_v54  ;;  %v2856_v54 = vld [vmem:[%s4623_s3 + $0x48] sm:$0xff] }
  0xde   :  { %3717 = vmatprep.subr.bf16.mxu0 %v4213_v31  ;;  %v3820_v60 = vpack.c.bf16 %v2856_v54, %v2855_v53 }
  0xdf   :  { %3815 = vmatpush3.bf16.msra.mxu1 %v3812_v48 }
  0xe0   :  { %3817 = vmatprep.subr.bf16.mxu1 %v3816_v51 }
  0xe1   :  { %3718 = vmatpush3.bf16.msra.mxu0 %v4144_v55 }
  0xe2   :  { %3719 = vmatprep.subr.bf16.mxu0 %v4213_v31 }
  0xe3   :  { %3819 = vmatpush3.bf16.msra.mxu1 %v3816_v51 }
  0xe4   :  { %3821 = vmatprep.subr.bf16.mxu1 %v3820_v60 }
  0xe5   :  { %3720 = vmatpush3.bf16.msra.mxu0 %v4145_v56 }
  0xe6   :  { %3721 = vmatprep.subr.bf16.mxu0 %v4213_v31 }
  0xe7   :  { %3823 = vmatpush3.bf16.msra.mxu1 %v3820_v60 }
  0xe9   :  { %3722 = vmatpush3.bf16.msra.mxu0 %v4146_v61 }
  0xea   :  { %3723 = vmatprep.subr.bf16.mxu0 %v4213_v31 }
  0xed   :  { %3724 = vmatpush3.bf16.msra.mxu0 %v4147_v2 }
  0xee   :  { %3725 = vmatprep.subr.bf16.mxu0 %v4213_v31 }
  0xf1   :  { %3726 = vmatpush3.bf16.msra.mxu0 %v4148_v6 }
  0xf4   :  { %3728 = vmatmul.mubr.bf16.vlgmr.msra.gmra.mrb[24].mxu0 %v700_v12 }
 0x107   :  { %v3416_v5 = vpop.f32.mrb[0].mxu0 }
 0x108   :  { %v3417_v8 = vpop.f32.mrb[1].mxu0 }
 0x109   :  { %v3418_v9 = vadd.f32 %v3417_v8, %v3416_v5  ;;  %v3419_v10 = vpop.f32.mrb[2].mxu0  ;;  %v3438_v36 = vpop.f32.mrb[0].mxu1  ;;  %v3824_v8 = vpack.c.bf16 %v2858_v1, %v2857_v0 }
 0x10a   :  { %v3420_v11 = vpop.f32.mrb[3].mxu0  ;;  %v3439_v15 = vpop.f32.mrb[1].mxu1 }
 0x10b   :  { %v2343_v13 = vadd.f32 %v3418_v9, %v3192_v7  ;;  %v3421_v14 = vadd.f32 %v3420_v11, %v3419_v10  ;;  %v3440_v17 = vadd.f32 %v3439_v15, %v3438_v36  ;;  %v3441_v18 = vpop.f32.mrb[2].mxu1  ;;  %3825 = vmatprep.subr.bf16.mxu1 %v3824_v8  ;;  %v2859_v10 = vld [vmem:[%s4623_s3 + $0x60] sm:$0xff]  ;;  %v2860_v11 = vld [vmem:[%s4623_s3 + $0x68] sm:$0xff]  ;;  %v2862_v36 = vld [vmem:[%s4623_s3 + $0x78] sm:$0xff] }
 0x10c   :  { %v3442_v19 = vpop.f32.mrb[3].mxu1  ;;  %3827 = vmatpush3.bf16.msra.mxu1 %v3824_v8  ;;  %v3828_v12 = vpack.c.bf16 %v2860_v11, %v2859_v10  ;;  %v2951_v15 = vld [vmem:[%s4625_s5] sm:$0xff] }
 0x10d   :  { %v2346_v16 = vadd.f32 %v3421_v14, %v3192_v7  ;;  %v2384_v20 = vadd.f32 %v3440_v17, %v2343_v13  ;;  %v3443_v21 = vadd.f32 %v3442_v19, %v3441_v18  ;;  %v2861_v13 = vld [vmem:[%s4623_s3 + $0x70] sm:$0xff]  ;;  %v2954_v19 = vld [vmem:[%s4625_s5 + $0x18] sm:$0xff] }
 0x10e   :  { %3829 = vmatprep.subr.bf16.mxu1 %v3828_v12  ;;  %v3832_v14 = vpack.c.bf16 %v2862_v36, %v2861_v13  ;;  %v2953_v17 = vld [vmem:[%s4625_s5 + $0x10] sm:$0xff] }
 0x10f   :  { %v2387_v22 = vadd.f32 %v3443_v21, %v2346_v16  ;;  %v2952_v16 = vld [vmem:[%s4625_s5 + $0x8] sm:$0xff] }
 0x110   :  { %3831 = vmatpush3.bf16.msra.mxu1 %v3828_v12  ;;  %v3836_v18 = vpack.c.bf16 %v2952_v16, %v2951_v15  ;;  %v2955_v15 = vld [vmem:[%s4625_s5 + $0x20] sm:$0xff]  ;;  %v2956_v16 = vld [vmem:[%s4625_s5 + $0x28] sm:$0xff] }
 0x111   :  { %3833 = vmatprep.subr.bf16.mxu1 %v3832_v14 }
 0x112   :  { %3837 = vmatprep.subr.bf16.mxu0 %v3836_v18 }
 0x113   :  { %3839 = vmatpush3.bf16.msra.mxu0 %v3836_v18  ;;  %v2957_v18 = vld [vmem:[%s4625_s5 + $0x30] sm:$0xff] }
 0x114   :  { %3835 = vmatpush3.bf16.msra.mxu1 %v3832_v14 }
 0x127   :  { %v3460_v23 = vpop.f32.mrb[4].mxu0 }
 0x128   :  { %v3461_v24 = vpop.f32.mrb[5].mxu0 }
 0x129   :  { %v3462_v25 = vadd.f32 %v3461_v24, %v3460_v23  ;;  %v3463_v26 = vpop.f32.mrb[6].mxu0  ;;  %v3482_v27 = vpop.f32.mrb[4].mxu1 }
 0x12a   :  { %v3464_v28 = vpop.f32.mrb[7].mxu0  ;;  %v3483_v31 = vpop.f32.mrb[5].mxu1 }
 0x12b   :  { %v2425_v29 = vadd.f32 %v3462_v25, %v2384_v20  ;;  %v3465_v30 = vadd.f32 %v3464_v28, %v3463_v26  ;;  %v3484_v32 = vadd.f32 %v3483_v31, %v3482_v27  ;;  %v3485_v33 = vpop.f32.mrb[6].mxu1  ;;  %v3840_v20 = vpack.c.bf16 %v2954_v19, %v2953_v17  ;;  %v2958_v19 = vld [vmem:[%s4625_s5 + $0x38] sm:$0xff] }
 0x12c   :  { %v3486_v35 = vpop.f32.mrb[7].mxu1  ;;  %v3844_v17 = vpack.c.bf16 %v2956_v16, %v2955_v15 }
 0x12d   :  { %v2428_v34 = vadd.f32 %v3465_v30, %v2387_v22  ;;  %v2466_v37 = vadd.f32 %v3484_v32, %v2425_v29  ;;  %v3487_v38 = vadd.f32 %v3486_v35, %v3485_v33  ;;  %3841 = vmatprep.subr.bf16.mxu0 %v3840_v20 }
 0x12e   :  { %3843 = vmatpush3.bf16.msra.mxu0 %v3840_v20  ;;  %v3848_v20 = vpack.c.bf16 %v2958_v19, %v2957_v18 }
 0x12f   :  { %v2469_v39 = vadd.f32 %v3487_v38, %v2428_v34  ;;  %3845 = vmatprep.subr.bf16.mxu0 %v3844_v17 }
 0x132   :  { %3847 = vmatpush3.bf16.msra.mxu0 %v3844_v17 }
 0x133   :  { %3849 = vmatprep.subr.bf16.mxu0 %v3848_v20 }
 0x136   :  { %3851 = vmatpush3.bf16.msra.mxu0 %v3848_v20 }
 0x147   :  { %v3504_v52 = vpop.f32.mrb[8].mxu0 }
 0x148   :  { %v3505_v55 = vpop.f32.mrb[9].mxu0 }
 0x149   :  { %v3506_v56 = vadd.f32 %v3505_v55, %v3504_v52  ;;  %v3507_v57 = vpop.f32.mrb[10].mxu0  ;;  %v3526_v58 = vpop.f32.mrb[8].mxu1 }
 0x14a   :  { %v3508_v59 = vpop.f32.mrb[11].mxu0  ;;  %v3527_v63 = vpop.f32.mrb[9].mxu1 }
 0x14b   :  { %v2507_v61 = vadd.f32 %v3506_v56, %v2466_v37  ;;  %v3509_v62 = vadd.f32 %v3508_v59, %v3507_v57  ;;  %v3528_v2 = vadd.f32 %v3527_v63, %v3526_v58  ;;  %v3529_v3 = vpop.f32.mrb[10].mxu1 }
 0x14c   :  { %v3530_v5 = vpop.f32.mrb[11].mxu1 }
 0x14d   :  { %v2510_v4 = vadd.f32 %v3509_v62, %v2469_v39  ;;  %v2548_v6 = vadd.f32 %v3528_v2, %v2507_v61  ;;  %v3531_v7 = vadd.f32 %v3530_v5, %v3529_v3 }
 0x14f   :  { %v2551_v9 = vadd.f32 %v3531_v7, %v2510_v4 }
 0x167   :  { %v3548_v21 = vpop.f32.mrb[12].mxu0 }
 0x168   :  { %v3549_v22 = vpop.f32.mrb[13].mxu0 }
 0x169   :  { %v3550_v23 = vadd.f32 %v3549_v22, %v3548_v21  ;;  %v3551_v24 = vpop.f32.mrb[14].mxu0  ;;  %v3570_v27 = vpop.f32.mrb[12].mxu1  ;;  %v3054_v21 = vld [vmem:[%s4627_s7] sm:$0xff]  ;;  %v3055_v22 = vld [vmem:[%s4627_s7 + $0x8] sm:$0xff] }
 0x16a   :  { %v3552_v25 = vpop.f32.mrb[15].mxu0  ;;  %v3571_v29 = vpop.f32.mrb[13].mxu1 }
 0x16b   :  { %v2589_v26 = vadd.f32 %v3550_v23, %v2548_v6  ;;  %v3553_v28 = vadd.f32 %v3552_v25, %v3551_v24  ;;  %v3572_v31 = vadd.f32 %v3571_v29, %v3570_v27  ;;  %v3573_v32 = vpop.f32.mrb[14].mxu1  ;;  %v3056_v23 = vld [vmem:[%s4627_s7 + $0x10] sm:$0xff]  ;;  %v3852_v24 = vpack.c.bf16 %v3055_v22, %v3054_v21  ;;  %v3057_v25 = vld [vmem:[%s4627_s7 + $0x18] sm:$0xff]  ;;  %v3393_v27 = vld [vmem:[%s4624_s4] ss:$0 sm:$0xff] }
 0x16c   :  { %v3574_v33 = vpop.f32.mrb[15].mxu1 }
 0x16d   :  { %v2592_v30 = vadd.f32 %v3553_v28, %v2551_v9  ;;  %v2630_v34 = vadd.f32 %v3572_v31, %v2589_v26  ;;  %v3575_v35 = vadd.f32 %v3574_v33, %v3573_v32  ;;  %v3856_v26 = vpack.c.bf16 %v3057_v25, %v3056_v23  ;;  %3853 = vmatprep.subr.bf16.mxu1 %v3852_v24 }
 0x16f   :  { %v2633_v37 = vadd.f32 %v3575_v35, %v2592_v30 }
 0x187   :  { %v3592_v38 = vpop.f32.mrb[16].mxu0 }
 0x188   :  { %v3593_v39 = vpop.f32.mrb[17].mxu0 }
 0x189   :  { %v3594_v40 = vadd.f32 %v3593_v39, %v3592_v38  ;;  %v3595_v41 = vpop.f32.mrb[18].mxu0  ;;  %v3614_v42 = vpop.f32.mrb[16].mxu1  ;;  %v3059_v38 = vld [vmem:[%s4627_s7 + $0x28] sm:$0xff] }
 0x18a   :  { %v3596_v43 = vpop.f32.mrb[19].mxu0  ;;  %v3615_v46 = vpop.f32.mrb[17].mxu1 }
 0x18b   :  { %v2671_v44 = vadd.f32 %v3594_v40, %v2630_v34  ;;  %v3597_v45 = vadd.f32 %v3596_v43, %v3595_v41  ;;  %v3616_v47 = vadd.f32 %v3615_v46, %v3614_v42  ;;  %v3617_v48 = vpop.f32.mrb[18].mxu1  ;;  %v3060_v40 = vld [vmem:[%s4627_s7 + $0x30] sm:$0xff]  ;;  %v3061_v41 = vld [vmem:[%s4627_s7 + $0x38] sm:$0xff]  ;;  %v3394_v43 = vld [vmem:[%s4626_s6] ss:$0 sm:$0xff] }
 0x18c   :  { %v3618_v50 = vpop.f32.mrb[19].mxu1  ;;  %v3864_v42 = vpack.c.bf16 %v3061_v41, %v3060_v40 }
 0x18d   :  { %v2674_v49 = vadd.f32 %v3597_v45, %v2633_v37  ;;  %v2712_v51 = vadd.f32 %v3616_v47, %v2671_v44  ;;  %v3619_v52 = vadd.f32 %v3618_v50, %v3617_v48  ;;  %v3058_v37 = vld [vmem:[%s4627_s7 + $0x20] sm:$0xff] }
 0x18e   :  { %v3860_v39 = vpack.c.bf16 %v3059_v38, %v3058_v37 }
 0x18f   :  { %v2715_v53 = vadd.f32 %v3619_v52, %v2674_v49  ;;  %v3397_v52 = vld [vmem:[%s4628_s8] ss:$0 sm:$0xff] }
 0x1a7   :  { %v3636_v54 = vpop.f32.mrb[20].mxu0 }
 0x1a8   :  { %v3637_v55 = vpop.f32.mrb[21].mxu0 }
 0x1a9   :  { %v3638_v56 = vadd.f32 %v3637_v55, %v3636_v54  ;;  %v3639_v57 = vpop.f32.mrb[22].mxu0  ;;  %v3658_v58 = vpop.f32.mrb[20].mxu1 }
 0x1aa   :  { %v3640_v59 = vpop.f32.mrb[23].mxu0  ;;  %v3659_v62 = vpop.f32.mrb[21].mxu1 }
 0x1ab   :  { %v2753_v60 = vadd.f32 %v3638_v56, %v2712_v51  ;;  %v3641_v61 = vadd.f32 %v3640_v59, %v3639_v57  ;;  %v3660_v63 = vadd.f32 %v3659_v62, %v3658_v58  ;;  %v3661_v0 = vpop.f32.mrb[22].mxu1 }
 0x1ac   :  { %v3662_v2 = vpop.f32.mrb[23].mxu1 }
 0x1ad   :  { %v2756_v1 = vadd.f32 %v3641_v61, %v2715_v53  ;;  %v3663_v3 = vadd.f32 %v3662_v2, %v3661_v0  ;;  %v2794_v4 = vadd.f32 %v3660_v63, %v2753_v60 }
 0x1af   :  { %v2797_v5 = vadd.f32 %v3663_v3, %v2756_v1 }
 0x1c7   :  { %v2834_v6 = vpop.f32.mrb[24].mxu0 }
 0x1c8   :  { %v2835_v7 = vadd.f32 %v2834_v6, %v2794_v4  ;;  %v3729_v8 = vpop.f32.mrb[25].mxu0 }
 0x1c9   :  { %v2837_v9 = vpop.f32.mrb[26].mxu0 }
 0x1ca   :  { %v2843_v10 = vmul.f32 0.01, %v2835_v7  ;;  %v2838_v11 = vadd.f32 %v2837_v9, %v2797_v5  ;;  %v3730_v12 = vpop.f32.mrb[27].mxu0  ;;  %vm2841_vm1 = vcmp.ge.f32.partialorder %v2835_v7, 0.0 }
 0x1cc   :  { %vm2842_vm2 = vcmp.ge.f32.partialorder %v2838_v11, 0.0  ;;  %v2844_v13 = vmul.f32 0.01, %v2838_v11  ;;  %v2845_v36 = vsel %vm2841_vm1, %v2835_v7, %v2843_v10 }
 0x1cd   :  { %3763 = vmatprep.mubr.f32.mxu1 %v2845_v36 }
 0x1ce   :  { %v2846_v14 = vsel %vm2842_vm2, %v2838_v11, %v2844_v13 }
 0x1cf   :  { %3764 = vmatmul.mubr.f32.vlgmr.msra.gmra.mrb[24].mxu1 %v2846_v14 }
 0x1d0   :  { %3855 = vmatpush3.bf16.msra.mxu1 %v3852_v24 }
 0x1d1   :  { %3857 = vmatprep.subr.bf16.mxu1 %v3856_v26 }
 0x1d4   :  { %3859 = vmatpush3.bf16.msra.mxu1 %v3856_v26 }
 0x1d5   :  { %3861 = vmatprep.subr.bf16.mxu1 %v3860_v39 }
 0x1d8   :  { %3863 = vmatpush3.bf16.msra.mxu1 %v3860_v39 }
 0x1d9   :  { %3865 = vmatprep.subr.bf16.mxu1 %v3864_v42 }
 0x1dc   :  { %3867 = vmatpush3.bf16.msra.mxu1 %v3864_v42 }
 0x2a2   :  { %v3765_v28 = vpop.f32.mrb[24].mxu1 }
 0x2a3   :  { %v2942_v29 = vadd.f32 %v3765_v28, %v3393_v27  ;;  %v2936_v30 = vpop.f32.mrb[25].mxu1 }
 0x2a4   :  { %v2937_v31 = vadd.f32 %v3393_v27, %v2936_v30 }
 0x2a5   :  { %v2948_v32 = vmul.f32 0.01, %v2942_v29  ;;  %vm2946_vm3 = vcmp.ge.f32.partialorder %v2942_v29, 0.0 }
 0x2a6   :  { %vm2945_vm4 = vcmp.ge.f32.partialorder %v2937_v31, 0.0  ;;  %v2947_v33 = vmul.f32 0.01, %v2937_v31 }
 0x2a7   :  { %v2950_v35 = vsel %vm2946_vm3, %v2942_v29, %v2948_v32 }
 0x2a8   :  { %v2949_v34 = vsel %vm2945_vm4, %v2937_v31, %v2947_v33 }
 0x2a9   :  { %3782 = vmatprep.mubr.msk.f32.mxu0 %vm2966_vm5, %v2949_v34 }
 0x2aa   :  { %3783 = vmatmul.mubr.msk.f32.vlgmr.msra.gmra.mrb[28].mxu0 %vm2966_vm5, %v2950_v35 }
 0x37d   :  { %v3784_v44 = vpop.f32.mrb[28].mxu0 }
 0x37e   :  { %v3045_v45 = vadd.f32 %v3784_v44, %v3394_v43  ;;  %v3039_v46 = vpop.f32.mrb[29].mxu0 }
 0x37f   :  { %v3040_v47 = vadd.f32 %v3394_v43, %v3039_v46 }
 0x380   :  { %v3051_v48 = vmul.f32 0.01, %v3045_v45  ;;  %vm3049_vm6 = vcmp.ge.f32.partialorder %v3045_v45, 0.0 }
 0x381   :  { %vm3048_vm7 = vcmp.ge.f32.partialorder %v3040_v47, 0.0  ;;  %v3050_v49 = vmul.f32 0.01, %v3040_v47 }
 0x382   :  { %v3053_v51 = vsel %vm3049_vm6, %v3045_v45, %v3051_v48 }
 0x383   :  { %v3052_v50 = vsel %vm3048_vm7, %v3040_v47, %v3050_v49 }
 0x384   :  { %3801 = vmatprep.mubr.msk.f32.mxu1 %vm2966_vm5, %v3052_v50 }
 0x385   :  { %3802 = vmatmul.mubr.msk.f32.vlgmr.msra.gmra.mrb[26].mxu1 %vm2966_vm5, %v3053_v51 }
 0x458   :  { %v3803_v53 = vpop.f32.mrb[26].mxu1 }
 0x459   :  { %v3141_v54 = vpop.f32.mrb[27].mxu1  ;;  %v3147_v56 = vadd.f32 %v3803_v53, %v3397_v52 }
 0x45a   :  { %v3142_v55 = vadd.f32 %v3397_v52, %v3141_v54 }
 0x45b   :  { %v3154_v58 = vsel %vm3150_vm8, %v3147_v56, -inf }
 0x45c   :  { %v3151_v57 = vsel %vm3150_vm8, %v3142_v55, -inf }
 0x45d   :  { %3152 = vmax.xlane.f32.xlu0 %v3151_v57 }
 0x461   :  { %3155 = vmax.xlane.f32.xlu0 %v3154_v58 }
 0x4ea   :  { %v3153_v59 = vpop.xlane.xlu0 %3152 }
 0x4eb   :  { %v3157_v60 = vsub.f32 %v3142_v55, %v3153_v59 }
 0x4ed   :  { %v3159_v61 = vmul.f32 1.442695, %v3157_v60 }
 0x4ee   :  { %v3156_v62 = vpop.xlane.xlu0 %3155 }
 0x4ef   :  { %4153 = vpow2.f32 %v3159_v61  ;;  %v3158_v63 = vsub.f32 %v3147_v56, %v3156_v62 }
 0x4f1   :  { %v3161_v0 = vmul.f32 1.442695, %v3158_v63 }
 0x4f3   :  { %4155 = vpow2.f32 %v3161_v0 }
 0x4f9   :  { %v4154_v1 = vpop.eup %4153 }
 0x4fa   :  { %v3163_v2 = vsel %vm3150_vm8, %v4154_v1, 0.0 }
 0x4fb   :  { %3164 = vadd.xlane.f32.xlu1 %v3163_v2 }
 0x4fd   :  { %v4156_v3 = vpop.eup %4155 }
 0x4fe   :  { %v3166_v4 = vsel %vm3150_vm8, %v4156_v3, 0.0 }
 0x4ff   :  { %3167 = vadd.xlane.f32.xlu1 %v3166_v4 }
 0x588   :  { %v3165_v5 = vpop.xlane.xlu1 %3164 }
 0x589   :  { %4157 = vrcp.f32 %v3165_v5 }
 0x58c   :  { %v3168_v6 = vpop.xlane.xlu1 %3167 }
 0x58d   :  { %4159 = vrcp.f32 %v3168_v6 }
 0x593   :  { %v4158_v7 = vpop.eup %4157 }
 0x594   :  { %v3171_v8 = vmul.f32 %v4158_v7, %v4154_v1 }
 0x596   :  { %3173 = vst.msk [vmem:[#allocation5] sm:$0xff] %vm3150_vm8, %v3171_v8 }
 0x597   :  { %v4160_v9 = vpop.eup %4159 }
 0x598   :  { %v3172_v10 = vmul.f32 %v4160_v9, %v4156_v3 }
 0x59a   :  { %3174 = vst.msk [vmem:[#allocation5 + $0x8] sm:$0xff] %vm3150_vm8, %v3172_v10 }
 0x59b   :  { %3179 = vsyncadd [#allocation4], 224  ;;  %s4215_s6 = smov [#allocation5]  }
 0x59c   :  { %s3180_s8 = sshll.u32 %s4215_s6, 4  ;;  %s3181_s8 = int_to_ptr.vmem [resolvable:$true] %s3180_s8 }
 0x59d   :  { %s4183_s12 = scalar_lea.vmem %s3181_s8, 32  ;;  %s4187_s13 = scalar_lea.vmem %s3181_s8, 256 }
 0x59e   :  { %p4184_p8 = scmp.ne.s32.totalorder %s3181_s8, %s4183_s12  ;;  %p4188_p9 = scmp.lt.s32.totalorder %s3181_s8, %s3181_s8 }
 0x59f   :  { %p4189_p10 = scmp.lt.s32.totalorder %s4187_s13, %s4183_s12 }
 0x5a1   :  { %p4190_p11 = por %p4189_p10, %p4188_p9 }
 0x5a3   :  { %p4191_p12 = pnand %p4190_p11, %p4184_p8 }
 0x5a5   :  { %4194 = shalt.err (!%p4191_p12)
}
 0x5a6   :  { %s4195_s16 = scalar_lea.hbm %s4629_s9, 32 }
 0x5a7   :  { %p4196_p13 = scmp.ne.s32.totalorder %s4629_s9, %s4195_s16  ;;  %p4199_p0 = scmp.lt.u32.totalorder %s4195_s16, %s4629_s9 }
 0x5a9   :  { %p4201_p1 = pnand %p4199_p0, %p4196_p13 }
 0x5ab   :  { %4204 = shalt.err (!%p4201_p1)
}
 0x5ac   :  { %s4216_s19 = smov 32   ;;  %s4217_s20 = smov 2  }
 0x5ad   :  { %3186 = dma.vmem_to_hbm [thread:$0]  %s3181_s8, 32, %s4629_s9, [#allocation4], %s4216_s19, %s4216_s19, %s4217_s20  }
 0x5ae   :  { %4207 = dma.done.wait [#allocation4], 256  }
 0x5af   :  { %4208 = vsyncadd [#allocation4], 4294967040 }
 0x5b0   :  { %3190 = vsyncpa [#allocation3], 1 }
 0x5b1   :  { %3191 = vsyncpa [#allocation4], 1 }

</bundles_post_ra>
